<compile_context>
chip_gen: v5e
topology: v5e:2x2
jax: 0.10.0
libtpu: 0.0.40
codegen_flags: <defaults>
</compile_context>

<pallas_src>
import jax
import jax.numpy as jnp
import numpy as np
from jax import lax
from jax.experimental import pallas as pl
from jax.experimental.pallas import tpu as pltpu

LANES = 128        # lane-dense padded width for every GEMM N dimension
MAX_TILE_M = 512   # M-tile upper bound (multiple of 8; a few MiB VMEM worst case)


def _pick_tile_m(m):
    # Whole array if it fits one tile (always a legal block shape), otherwise
    # a fixed 8-aligned tile with a masked partial last block.
    return m if m <= MAX_TILE_M else MAX_TILE_M


# ---------------------------------------------------------------------------
# Pallas kernels
# ---------------------------------------------------------------------------
def _conv_pool_kernel(x_ref, w_ref, b_ref, o_ref):
    """Fused conv-as-GEMM + bias + ReLU + 2x2 max-pool.

    x_ref : (TILE_M, K)   bf16  6x6 super-patch rows (one per pooled position)
    w_ref : (4, K, 128)   bf16  4 corner weight frames, Cout lane-padded to 128
    b_ref : (1, 128)      f32
    o_ref : (TILE_M, 128) bf16  pooled activations (lane-dense store)
    """
    x = x_ref[...]
    s = jnp.dot(x, w_ref[0], preferred_element_type=jnp.float32)
    for c in range(1, 4):
        s = jnp.maximum(s, jnp.dot(x, w_ref[c],
                                   preferred_element_type=jnp.float32))
    # relu(max_c(s_c) + b) == max-pool(relu(conv + b))  (relu is monotonic).
    o_ref[...] = jnp.maximum(s + b_ref[...], 0.0).astype(o_ref.dtype)


def _fc_stack_kernel(x_ref, w1_ref, b1_ref, w2_ref, b2_ref, w3_ref, b3_ref,
                     o_ref):
    """fc1+ReLU -> fc2+ReLU -> fc3, fused; intermediates stay in VMEM/vregs."""
    h = jnp.dot(x_ref[...], w1_ref[...], preferred_element_type=jnp.float32)
    h = jnp.maximum(h + b1_ref[...], 0.0).astype(jnp.bfloat16)
    h = jnp.dot(h, w2_ref[...], preferred_element_type=jnp.float32)
    h = jnp.maximum(h + b2_ref[...], 0.0).astype(jnp.bfloat16)
    y = jnp.dot(h, w3_ref[...], preferred_element_type=jnp.float32)
    o_ref[...] = (y + b3_ref[...]).astype(o_ref.dtype)


# ---------------------------------------------------------------------------
# pallas_call wrappers
# ---------------------------------------------------------------------------
def conv_pool_gemm(patches, w, b):
    """patches: (M, K) bf16 super-patch rows; w: (4,K,128) bf16; b: (1,128) f32."""
    M, K = patches.shape
    N = w.shape[-1]
    tm = _pick_tile_m(M)
    return pl.pallas_call(
        _conv_pool_kernel,
        out_shape=jax.ShapeDtypeStruct((M, N), jnp.bfloat16),
        grid_spec=pltpu.PrefetchScalarGridSpec(
            num_scalar_prefetch=0,
            grid=(pl.cdiv(M, tm),),
            in_specs=[pl.BlockSpec((tm, K), lambda i: (i, 0)),
                      pl.BlockSpec((4, K, N), lambda i: (0, 0, 0)),
                      pl.BlockSpec((1, N), lambda i: (0, 0))],
            out_specs=pl.BlockSpec((tm, N), lambda i: (i, 0)),
        ),
        compiler_params=pltpu.CompilerParams(
            dimension_semantics=("parallel",)),
    )(patches, w, b)


def fc_stack(x, w1, b1, w2, b2, w3, b3):
    """Single-kernel 3-layer MLP. x: (M, K) bf16; weights lane-padded bf16."""
    M, K = x.shape
    N = w3.shape[1]
    tm = _pick_tile_m(M)

    def full(shape):
        return pl.BlockSpec(shape, lambda i: (0, 0))

    return pl.pallas_call(
        _fc_stack_kernel,
        out_shape=jax.ShapeDtypeStruct((M, N), jnp.float32),
        grid_spec=pltpu.PrefetchScalarGridSpec(
            num_scalar_prefetch=0,
            grid=(pl.cdiv(M, tm),),
            in_specs=[pl.BlockSpec((tm, K), lambda i: (i, 0)),
                      full(w1.shape), full(b1.shape),
                      full(w2.shape), full(b2.shape),
                      full(w3.shape), full(b3.shape)],
            out_specs=pl.BlockSpec((tm, N), lambda i: (i, 0)),
        ),
        compiler_params=pltpu.CompilerParams(
            dimension_semantics=("parallel",)),
    )(x, w1, b1, w2, b2, w3, b3)


# ---------------------------------------------------------------------------
# im2col glue (plain JAX inside jit)
# ---------------------------------------------------------------------------
def _im2col_superpatch(x, k, c_real, k_pad):
    """One (k+1)x(k+1) super-patch row per pooled output position.

    x: (B, H, W, C) NHWC (C possibly lane-padded; only :c_real is gathered).
    Returns a (B*Hp*Wp, k_pad) bf16 plane + pooled spatial shape.  Zero
    K-padding is folded into the concatenate (no extra HBM pass).  Row tap
    order is (ph, pw, c) to match the prepacked 6x6 weight frames.
    """
    B, H, W, _ = x.shape
    Hp, Wp = (H - k + 1) // 2, (W - k + 1) // 2
    kk = k + 1                                   # 6x6 taps cover all 4 corners
    K = kk * kk * c_real
    assert k_pad >= K
    cols = [x[:, ph: ph + 2 * (Hp - 1) + 1: 2,
              pw: pw + 2 * (Wp - 1) + 1: 2, :c_real]
            for ph in range(kk) for pw in range(kk)]
    if k_pad > K:
        cols.append(jnp.zeros((B, Hp, Wp, k_pad - K), x.dtype))
    plane = jnp.concatenate(cols, axis=-1)       # (B, Hp, Wp, k_pad)
    return plane.reshape(B * Hp * Wp, k_pad), (B, Hp, Wp)


# ---------------------------------------------------------------------------
# LeNet forward (Pallas) and pure-f32 JAX reference
# ---------------------------------------------------------------------------
def lenet_forward(x_nchw, kp):
    """x_nchw: (B,3,32,32) f32 -> (B,10) f32 logits."""
    x = jnp.transpose(x_nchw, (0, 2, 3, 1)).astype(jnp.bfloat16)   # NHWC bf16
    # conv1 (3->6) + ReLU + pool: K = 6*6*3 = 108 -> padded 128
    p1, (B, H1, W1) = _im2col_superpatch(x, 5, 3, 128)
    y1 = conv_pool_gemm(p1, kp["w1"], kp["b1"])          # (B*14*14, 128) bf16
    x1 = y1.reshape(B, H1, W1, LANES)
    # conv2 (6->16) + ReLU + pool: K = 6*6*6 = 216 -> padded 256
    p2, (B, H2, W2) = _im2col_superpatch(x1, 5, 6, 256)
    y2 = conv_pool_gemm(p2, kp["w2"], kp["b2"])          # (B*5*5, 128) bf16
    # Flatten is a free contiguous reshape: rows are (b, hp, wp), lanes are c;
    # fc1's rows were permuted/zero-padded at init to match this layout.
    xf = y2.reshape(B, H2 * W2 * LANES)                  # (B, 3200) bf16
    logits = fc_stack(xf, kp["wf1"], kp["bf1"], kp["wf2"], kp["bf2"],
                      kp["wf3"], kp["bf3"])              # (B, 128) f32
    return logits[:, :10]


def lenet_reference(x_nchw, p):
    x = jnp.transpose(x_nchw, (0, 2, 3, 1))
    dn = ("NHWC", "HWIO", "NHWC")
    x = lax.conv_general_dilated(x, p["w1"], (1, 1), "VALID",
                                 dimension_numbers=dn) + p["b1"]
    x = jnp.maximum(x, 0.0)
    x = lax.reduce_window(x, -jnp.inf, lax.max, (1, 2, 2, 1), (1, 2, 2, 1), "VALID")
    x = lax.conv_general_dilated(x, p["w2"], (1, 1), "VALID",
                                 dimension_numbers=dn) + p["b2"]
    x = jnp.maximum(x, 0.0)
    x = lax.reduce_window(x, -jnp.inf, lax.max, (1, 2, 2, 1), (1, 2, 2, 1), "VALID")
    B = x.shape[0]
    x = jnp.transpose(x, (0, 3, 1, 2)).reshape(B, 400)   # PyTorch view order
    x = jnp.maximum(x @ p["wf1"] + p["bf1"], 0.0)
    x = jnp.maximum(x @ p["wf2"] + p["bf2"], 0.0)
    return x @ p["wf3"] + p["bf3"]


# ---------------------------------------------------------------------------
# Parameters
# ---------------------------------------------------------------------------
def init_params(key):
    ks = jax.random.split(key, 10)

    def rnd(k, shape, scale):
        return (scale * jax.random.normal(k, shape)).astype(jnp.float32)

    return dict(
        w1=rnd(ks[0], (5, 5, 3, 6), 0.10), b1=rnd(ks[1], (6,), 0.10),
        w2=rnd(ks[2], (5, 5, 6, 16), 0.10), b2=rnd(ks[3], (16,), 0.10),
        # fc1 rows in PyTorch x.view(-1, 16*5*5) order: (c, h, w)
        wf1=rnd(ks[4], (400, 120), 0.05), bf1=rnd(ks[5], (120,), 0.05),
        wf2=rnd(ks[6], (120, 84), 0.05), bf2=rnd(ks[7], (84,), 0.05),
        wf3=rnd(ks[8], (84, 10), 0.05), bf3=rnd(ks[9], (10,), 0.05),
    )


def _pad2d(a, rows, cols):
    return jnp.pad(a, ((0, rows - a.shape[0]), (0, cols - a.shape[1])))


def prepare_params(p):
    """One-time repack: bf16 weights, lane-padded N (->128), K-padded rows,
    5x5 conv kernels embedded as four 6x6 corner frames, and fc1 rows permuted
    from PyTorch (c,h,w) order to (h,w,c[padded 128])."""
    def conv_w_corners(w_hwio, k_pad):
        kh, kw, ci, co = w_hwio.shape                    # 5,5,ci,co
        frames = []
        for dy in (0, 1):
            for dx in (0, 1):
                f = jnp.zeros((kh + 1, kw + 1, ci, co), w_hwio.dtype)
                f = f.at[dy:dy + kh, dx:dx + kw].set(w_hwio)
                w2d = f.reshape((kh + 1) * (kw + 1) * ci, co)  # rows: (ph,pw,ci)
                frames.append(_pad2d(w2d, k_pad, LANES))
        return jnp.stack(frames).astype(jnp.bfloat16)    # (4, k_pad, 128)

    def bias(b):
        return jnp.pad(b, (0, LANES - b.shape[0])
                       ).reshape(1, LANES).astype(jnp.float32)

    wf1 = p["wf1"].reshape(16, 5, 5, 120).transpose(1, 2, 0, 3)   # (h,w,c,out)
    wf1 = jnp.pad(wf1, ((0, 0), (0, 0), (0, LANES - 16), (0, LANES - 120)))
    wf1 = wf1.reshape(5 * 5 * LANES, LANES).astype(jnp.bfloat16)

    return dict(
        w1=conv_w_corners(p["w1"], 128), b1=bias(p["b1"]),
        w2=conv_w_corners(p["w2"], 256), b2=bias(p["b2"]),
        wf1=wf1, bf1=bias(p["bf1"]),
        wf2=_pad2d(p["wf2"], LANES, LANES).astype(jnp.bfloat16),
        bf2=bias(p["bf2"]),
        wf3=_pad2d(p["wf3"], LANES, LANES).astype(jnp.bfloat16),
        bf3=bias(p["bf3"]),
    )


if __name__ == "__main__":
    key = jax.random.PRNGKey(0)
    k_in, k_p = jax.random.split(key)
    # 16*5*5 flatten implies 32x32 spatial input (CIFAR); batch=2.
    x = jax.random.normal(k_in, (2, 3, 32, 32), dtype=jnp.float32)
    params = init_params(k_p)
    kparams = prepare_params(params)

    fwd = jax.jit(lenet_forward)
    out = jax.block_until_ready(fwd(x, kparams))
    ref = jax.block_until_ready(lenet_reference(x, params))

    assert out.shape == (2, 10)
    # bf16 MXU inputs with f32 accumulation vs. pure-f32 reference.
    np.testing.assert_allclose(np.asarray(out), np.asarray(ref),
                               atol=2e-2, rtol=2e-2)
    print("KERNEL_OK")
</pallas_src>

<mosaic_0001>
module attributes {stable_mosaic.version = 11 : i64} {
  func.func @_conv_pool_kernel(%arg0: i32, %arg1: memref<392x128xbf16, #tpu.memory_space<vmem>>, %arg2: memref<4x128x128xbf16, #tpu.memory_space<vmem>>, %arg3: memref<1x128xf32, #tpu.memory_space<vmem>>, %arg4: memref<392x128xbf16, #tpu.memory_space<vmem>>) attributes {dimension_semantics = [#tpu.dimension_semantics<parallel>], iteration_bounds = array<i64: 1>, scalar_prefetch = 0 : i64, scratch_operands = 0 : i64, tpu.core_type = #tpu.core_type<tc>, window_params = [{transform_indices = @transform_0, window_bounds = array<i64: 392, 128>}, {pipeline_mode = #tpu.pipeline_mode<synchronous>, transform_indices = @transform_1, window_bounds = array<i64: 4, 128, 128>}, {pipeline_mode = #tpu.pipeline_mode<synchronous>, transform_indices = @transform_2, window_bounds = array<i64: 1, 128>}, {transform_indices = @transform_3, window_bounds = array<i64: 392, 128>}]} {
    %c0 = arith.constant 0 : index
    %c0_0 = arith.constant 0 : index
    %0 = vector.load %arg1[%c0, %c0_0] : memref<392x128xbf16, #tpu.memory_space<vmem>>, vector<392x128xbf16>
    %c0_1 = arith.constant 0 : index
    %c0_2 = arith.constant 0 : index
    %c0_3 = arith.constant 0 : index
    %1 = vector.load %arg2[%c0_1, %c0_2, %c0_3] : memref<4x128x128xbf16, #tpu.memory_space<vmem>>, vector<1x128x128xbf16>
    %2 = vector.shape_cast %1 : vector<1x128x128xbf16> to vector<128x128xbf16>
    %cst = arith.constant dense<0.000000e+00> : vector<392x128xf32>
    %3 = tpu.matmul %0, %2, %cst {dimension_numbers = #tpu.dot_dimension_numbers<[1], [0], [0], [1], [0, 0, 1, 1], [], []>} : vector<392x128xbf16>, vector<128x128xbf16>, vector<392x128xf32> -> vector<392x128xf32>
    %c1 = arith.constant 1 : index
    %c0_4 = arith.constant 0 : index
    %c0_5 = arith.constant 0 : index
    %4 = vector.load %arg2[%c1, %c0_4, %c0_5] : memref<4x128x128xbf16, #tpu.memory_space<vmem>>, vector<1x128x128xbf16>
    %5 = vector.shape_cast %4 : vector<1x128x128xbf16> to vector<128x128xbf16>
    %cst_6 = arith.constant dense<0.000000e+00> : vector<392x128xf32>
    %6 = tpu.matmul %0, %5, %cst_6 {dimension_numbers = #tpu.dot_dimension_numbers<[1], [0], [0], [1], [0, 0, 1, 1], [], []>} : vector<392x128xbf16>, vector<128x128xbf16>, vector<392x128xf32> -> vector<392x128xf32>
    %7 = arith.maximumf %3, %6 : vector<392x128xf32>
    %c2 = arith.constant 2 : index
    %c0_7 = arith.constant 0 : index
    %c0_8 = arith.constant 0 : index
    %8 = vector.load %arg2[%c2, %c0_7, %c0_8] : memref<4x128x128xbf16, #tpu.memory_space<vmem>>, vector<1x128x128xbf16>
    %9 = vector.shape_cast %8 : vector<1x128x128xbf16> to vector<128x128xbf16>
    %cst_9 = arith.constant dense<0.000000e+00> : vector<392x128xf32>
    %10 = tpu.matmul %0, %9, %cst_9 {dimension_numbers = #tpu.dot_dimension_numbers<[1], [0], [0], [1], [0, 0, 1, 1], [], []>} : vector<392x128xbf16>, vector<128x128xbf16>, vector<392x128xf32> -> vector<392x128xf32>
    %11 = arith.maximumf %7, %10 : vector<392x128xf32>
    %c3 = arith.constant 3 : index
    %c0_10 = arith.constant 0 : index
    %c0_11 = arith.constant 0 : index
    %12 = vector.load %arg2[%c3, %c0_10, %c0_11] : memref<4x128x128xbf16, #tpu.memory_space<vmem>>, vector<1x128x128xbf16>
    %13 = vector.shape_cast %12 : vector<1x128x128xbf16> to vector<128x128xbf16>
    %cst_12 = arith.constant dense<0.000000e+00> : vector<392x128xf32>
    %14 = tpu.matmul %0, %13, %cst_12 {dimension_numbers = #tpu.dot_dimension_numbers<[1], [0], [0], [1], [0, 0, 1, 1], [], []>} : vector<392x128xbf16>, vector<128x128xbf16>, vector<392x128xf32> -> vector<392x128xf32>
    %15 = arith.maximumf %11, %14 : vector<392x128xf32>
    %c0_13 = arith.constant 0 : index
    %c0_14 = arith.constant 0 : index
    %16 = vector.load %arg3[%c0_13, %c0_14] : memref<1x128xf32, #tpu.memory_space<vmem>>, vector<1x128xf32>
    %17 = vector.broadcast %16 : vector<1x128xf32> to vector<392x128xf32>
    %18 = arith.addf %15, %17 : vector<392x128xf32>
    %cst_15 = arith.constant 0.000000e+00 : f32
    %19 = vector.broadcast %cst_15 : f32 to vector<392x128xf32>
    %20 = arith.maximumf %18, %19 : vector<392x128xf32>
    %21 = arith.truncf %20 : vector<392x128xf32> to vector<392x128xbf16>
    %c0_16 = arith.constant 0 : index
    %c0_17 = arith.constant 0 : index
    %22 = vector.load %arg4[%c0_16, %c0_17] : memref<392x128xbf16, #tpu.memory_space<vmem>>, vector<392x128xbf16>
    tpu.vector_store %arg4[%c0_16, %c0_17], %21 {strides = array<i32>} : memref<392x128xbf16, #tpu.memory_space<vmem>>, vector<392x128xbf16>,
    return
  }
  func.func @transform_0(%arg0: i32) -> (i32, i32) {
    %c0_i32 = arith.constant 0 : i32
    %c0_i32_0 = arith.constant 0 : i32
    return %arg0, %c0_i32 : i32, i32
  }
  func.func @transform_1(%arg0: i32) -> (i32, i32, i32) {
    %c0_i32 = arith.constant 0 : i32
    %c0_i32_0 = arith.constant 0 : i32
    %c0_i32_1 = arith.constant 0 : i32
    %c0_i32_2 = arith.constant 0 : i32
    return %c0_i32, %c0_i32_0, %c0_i32_1 : i32, i32, i32
  }
  func.func @transform_2(%arg0: i32) -> (i32, i32) {
    %c0_i32 = arith.constant 0 : i32
    %c0_i32_0 = arith.constant 0 : i32
    %c0_i32_1 = arith.constant 0 : i32
    return %c0_i32, %c0_i32_0 : i32, i32
  }
  func.func @transform_3(%arg0: i32) -> (i32, i32) {
    %c0_i32 = arith.constant 0 : i32
    %c0_i32_0 = arith.constant 0 : i32
    return %arg0, %c0_i32 : i32, i32
  }
}

module attributes {stable_mosaic.version = 11 : i64} {
  func.func @_conv_pool_kernel(%arg0: i32, %arg1: memref<50x256xbf16, #tpu.memory_space<vmem>>, %arg2: memref<4x256x128xbf16, #tpu.memory_space<vmem>>, %arg3: memref<1x128xf32, #tpu.memory_space<vmem>>, %arg4: memref<50x128xbf16, #tpu.memory_space<vmem>>) attributes {dimension_semantics = [#tpu.dimension_semantics<parallel>], iteration_bounds = array<i64: 1>, scalar_prefetch = 0 : i64, scratch_operands = 0 : i64, tpu.core_type = #tpu.core_type<tc>, window_params = [{transform_indices = @transform_0, window_bounds = array<i64: 50, 256>}, {pipeline_mode = #tpu.pipeline_mode<synchronous>, transform_indices = @transform_1, window_bounds = array<i64: 4, 256, 128>}, {pipeline_mode = #tpu.pipeline_mode<synchronous>, transform_indices = @transform_2, window_bounds = array<i64: 1, 128>}, {transform_indices = @transform_3, window_bounds = array<i64: 50, 128>}]} {
    %c0 = arith.constant 0 : index
    %c0_0 = arith.constant 0 : index
    %0 = vector.load %arg1[%c0, %c0_0] : memref<50x256xbf16, #tpu.memory_space<vmem>>, vector<50x256xbf16>
    %c0_1 = arith.constant 0 : index
    %c0_2 = arith.constant 0 : index
    %c0_3 = arith.constant 0 : index
    %1 = vector.load %arg2[%c0_1, %c0_2, %c0_3] : memref<4x256x128xbf16, #tpu.memory_space<vmem>>, vector<1x256x128xbf16>
    %2 = vector.shape_cast %1 : vector<1x256x128xbf16> to vector<256x128xbf16>
    %cst = arith.constant dense<0.000000e+00> : vector<50x128xf32>
    %3 = tpu.matmul %0, %2, %cst {dimension_numbers = #tpu.dot_dimension_numbers<[1], [0], [0], [1], [0, 0, 1, 1], [], []>} : vector<50x256xbf16>, vector<256x128xbf16>, vector<50x128xf32> -> vector<50x128xf32>
    %c1 = arith.constant 1 : index
    %c0_4 = arith.constant 0 : index
    %c0_5 = arith.constant 0 : index
    %4 = vector.load %arg2[%c1, %c0_4, %c0_5] : memref<4x256x128xbf16, #tpu.memory_space<vmem>>, vector<1x256x128xbf16>
    %5 = vector.shape_cast %4 : vector<1x256x128xbf16> to vector<256x128xbf16>
    %cst_6 = arith.constant dense<0.000000e+00> : vector<50x128xf32>
    %6 = tpu.matmul %0, %5, %cst_6 {dimension_numbers = #tpu.dot_dimension_numbers<[1], [0], [0], [1], [0, 0, 1, 1], [], []>} : vector<50x256xbf16>, vector<256x128xbf16>, vector<50x128xf32> -> vector<50x128xf32>
    %7 = arith.maximumf %3, %6 : vector<50x128xf32>
    %c2 = arith.constant 2 : index
    %c0_7 = arith.constant 0 : index
    %c0_8 = arith.constant 0 : index
    %8 = vector.load %arg2[%c2, %c0_7, %c0_8] : memref<4x256x128xbf16, #tpu.memory_space<vmem>>, vector<1x256x128xbf16>
    %9 = vector.shape_cast %8 : vector<1x256x128xbf16> to vector<256x128xbf16>
    %cst_9 = arith.constant dense<0.000000e+00> : vector<50x128xf32>
    %10 = tpu.matmul %0, %9, %cst_9 {dimension_numbers = #tpu.dot_dimension_numbers<[1], [0], [0], [1], [0, 0, 1, 1], [], []>} : vector<50x256xbf16>, vector<256x128xbf16>, vector<50x128xf32> -> vector<50x128xf32>
    %11 = arith.maximumf %7, %10 : vector<50x128xf32>
    %c3 = arith.constant 3 : index
    %c0_10 = arith.constant 0 : index
    %c0_11 = arith.constant 0 : index
    %12 = vector.load %arg2[%c3, %c0_10, %c0_11] : memref<4x256x128xbf16, #tpu.memory_space<vmem>>, vector<1x256x128xbf16>
    %13 = vector.shape_cast %12 : vector<1x256x128xbf16> to vector<256x128xbf16>
    %cst_12 = arith.constant dense<0.000000e+00> : vector<50x128xf32>
    %14 = tpu.matmul %0, %13, %cst_12 {dimension_numbers = #tpu.dot_dimension_numbers<[1], [0], [0], [1], [0, 0, 1, 1], [], []>} : vector<50x256xbf16>, vector<256x128xbf16>, vector<50x128xf32> -> vector<50x128xf32>
    %15 = arith.maximumf %11, %14 : vector<50x128xf32>
    %c0_13 = arith.constant 0 : index
    %c0_14 = arith.constant 0 : index
    %16 = vector.load %arg3[%c0_13, %c0_14] : memref<1x128xf32, #tpu.memory_space<vmem>>, vector<1x128xf32>
    %17 = vector.broadcast %16 : vector<1x128xf32> to vector<50x128xf32>
    %18 = arith.addf %15, %17 : vector<50x128xf32>
    %cst_15 = arith.constant 0.000000e+00 : f32
    %19 = vector.broadcast %cst_15 : f32 to vector<50x128xf32>
    %20 = arith.maximumf %18, %19 : vector<50x128xf32>
    %21 = arith.truncf %20 : vector<50x128xf32> to vector<50x128xbf16>
    %c0_16 = arith.constant 0 : index
    %c0_17 = arith.constant 0 : index
    %22 = vector.load %arg4[%c0_16, %c0_17] : memref<50x128xbf16, #tpu.memory_space<vmem>>, vector<50x128xbf16>
    tpu.vector_store %arg4[%c0_16, %c0_17], %21 {strides = array<i32>} : memref<50x128xbf16, #tpu.memory_space<vmem>>, vector<50x128xbf16>,
    return
  }
  func.func @transform_0(%arg0: i32) -> (i32, i32) {
    %c0_i32 = arith.constant 0 : i32
    %c0_i32_0 = arith.constant 0 : i32
    return %arg0, %c0_i32 : i32, i32
  }
  func.func @transform_1(%arg0: i32) -> (i32, i32, i32) {
    %c0_i32 = arith.constant 0 : i32
    %c0_i32_0 = arith.constant 0 : i32
    %c0_i32_1 = arith.constant 0 : i32
    %c0_i32_2 = arith.constant 0 : i32
    return %c0_i32, %c0_i32_0, %c0_i32_1 : i32, i32, i32
  }
  func.func @transform_2(%arg0: i32) -> (i32, i32) {
    %c0_i32 = arith.constant 0 : i32
    %c0_i32_0 = arith.constant 0 : i32
    %c0_i32_1 = arith.constant 0 : i32
    return %c0_i32, %c0_i32_0 : i32, i32
  }
  func.func @transform_3(%arg0: i32) -> (i32, i32) {
    %c0_i32 = arith.constant 0 : i32
    %c0_i32_0 = arith.constant 0 : i32
    return %arg0, %c0_i32 : i32, i32
  }
}

module attributes {stable_mosaic.version = 11 : i64} {
  func.func @_fc_stack_kernel(%arg0: i32, %arg1: memref<2x3200xbf16, #tpu.memory_space<vmem>>, %arg2: memref<3200x128xbf16, #tpu.memory_space<vmem>>, %arg3: memref<1x128xf32, #tpu.memory_space<vmem>>, %arg4: memref<128x128xbf16, #tpu.memory_space<vmem>>, %arg5: memref<1x128xf32, #tpu.memory_space<vmem>>, %arg6: memref<128x128xbf16, #tpu.memory_space<vmem>>, %arg7: memref<1x128xf32, #tpu.memory_space<vmem>>, %arg8: memref<2x128xf32, #tpu.memory_space<vmem>>) attributes {dimension_semantics = [#tpu.dimension_semantics<parallel>], iteration_bounds = array<i64: 1>, scalar_prefetch = 0 : i64, scratch_operands = 0 : i64, tpu.core_type = #tpu.core_type<tc>, window_params = [{transform_indices = @transform_0, window_bounds = array<i64: 2, 3200>}, {pipeline_mode = #tpu.pipeline_mode<synchronous>, transform_indices = @transform_1, window_bounds = array<i64: 3200, 128>}, {pipeline_mode = #tpu.pipeline_mode<synchronous>, transform_indices = @transform_2, window_bounds = array<i64: 1, 128>}, {pipeline_mode = #tpu.pipeline_mode<synchronous>, transform_indices = @transform_3, window_bounds = array<i64: 128, 128>}, {pipeline_mode = #tpu.pipeline_mode<synchronous>, transform_indices = @transform_4, window_bounds = array<i64: 1, 128>}, {pipeline_mode = #tpu.pipeline_mode<synchronous>, transform_indices = @transform_5, window_bounds = array<i64: 128, 128>}, {pipeline_mode = #tpu.pipeline_mode<synchronous>, transform_indices = @transform_6, window_bounds = array<i64: 1, 128>}, {transform_indices = @transform_7, window_bounds = array<i64: 2, 128>}]} {
    %c0 = arith.constant 0 : index
    %c0_0 = arith.constant 0 : index
    %0 = vector.load %arg1[%c0, %c0_0] : memref<2x3200xbf16, #tpu.memory_space<vmem>>, vector<2x3200xbf16>
    %c0_1 = arith.constant 0 : index
    %c0_2 = arith.constant 0 : index
    %1 = vector.load %arg2[%c0_1, %c0_2] : memref<3200x128xbf16, #tpu.memory_space<vmem>>, vector<3200x128xbf16>
    %cst = arith.constant dense<0.000000e+00> : vector<2x128xf32>
    %2 = tpu.matmul %0, %1, %cst {dimension_numbers = #tpu.dot_dimension_numbers<[1], [0], [0], [1], [0, 0, 1, 1], [], []>} : vector<2x3200xbf16>, vector<3200x128xbf16>, vector<2x128xf32> -> vector<2x128xf32>
    %c0_3 = arith.constant 0 : index
    %c0_4 = arith.constant 0 : index
    %3 = vector.load %arg3[%c0_3, %c0_4] : memref<1x128xf32, #tpu.memory_space<vmem>>, vector<1x128xf32>
    %4 = vector.broadcast %3 : vector<1x128xf32> to vector<2x128xf32>
    %5 = arith.addf %2, %4 : vector<2x128xf32>
    %cst_5 = arith.constant 0.000000e+00 : f32
    %6 = vector.broadcast %cst_5 : f32 to vector<2x128xf32>
    %7 = arith.maximumf %5, %6 : vector<2x128xf32>
    %8 = arith.truncf %7 : vector<2x128xf32> to vector<2x128xbf16>
    %c0_6 = arith.constant 0 : index
    %c0_7 = arith.constant 0 : index
    %9 = vector.load %arg4[%c0_6, %c0_7] : memref<128x128xbf16, #tpu.memory_space<vmem>>, vector<128x128xbf16>
    %cst_8 = arith.constant dense<0.000000e+00> : vector<2x128xf32>
    %10 = tpu.matmul %8, %9, %cst_8 {dimension_numbers = #tpu.dot_dimension_numbers<[1], [0], [0], [1], [0, 0, 1, 1], [], []>} : vector<2x128xbf16>, vector<128x128xbf16>, vector<2x128xf32> -> vector<2x128xf32>
    %c0_9 = arith.constant 0 : index
    %c0_10 = arith.constant 0 : index
    %11 = vector.load %arg5[%c0_9, %c0_10] : memref<1x128xf32, #tpu.memory_space<vmem>>, vector<1x128xf32>
    %12 = vector.broadcast %11 : vector<1x128xf32> to vector<2x128xf32>
    %13 = arith.addf %10, %12 : vector<2x128xf32>
    %cst_11 = arith.constant 0.000000e+00 : f32
    %14 = vector.broadcast %cst_11 : f32 to vector<2x128xf32>
    %15 = arith.maximumf %13, %14 : vector<2x128xf32>
    %16 = arith.truncf %15 : vector<2x128xf32> to vector<2x128xbf16>
    %c0_12 = arith.constant 0 : index
    %c0_13 = arith.constant 0 : index
    %17 = vector.load %arg6[%c0_12, %c0_13] : memref<128x128xbf16, #tpu.memory_space<vmem>>, vector<128x128xbf16>
    %cst_14 = arith.constant dense<0.000000e+00> : vector<2x128xf32>
    %18 = tpu.matmul %16, %17, %cst_14 {dimension_numbers = #tpu.dot_dimension_numbers<[1], [0], [0], [1], [0, 0, 1, 1], [], []>} : vector<2x128xbf16>, vector<128x128xbf16>, vector<2x128xf32> -> vector<2x128xf32>
    %c0_15 = arith.constant 0 : index
    %c0_16 = arith.constant 0 : index
    %19 = vector.load %arg7[%c0_15, %c0_16] : memref<1x128xf32, #tpu.memory_space<vmem>>, vector<1x128xf32>
    %20 = vector.broadcast %19 : vector<1x128xf32> to vector<2x128xf32>
    %21 = arith.addf %18, %20 : vector<2x128xf32>
    %c0_17 = arith.constant 0 : index
    %c0_18 = arith.constant 0 : index
    %22 = vector.load %arg8[%c0_17, %c0_18] : memref<2x128xf32, #tpu.memory_space<vmem>>, vector<2x128xf32>
    tpu.vector_store %arg8[%c0_17, %c0_18], %21 {strides = array<i32>} : memref<2x128xf32, #tpu.memory_space<vmem>>, vector<2x128xf32>,
    return
  }
  func.func @transform_0(%arg0: i32) -> (i32, i32) {
    %c0_i32 = arith.constant 0 : i32
    %c0_i32_0 = arith.constant 0 : i32
    return %arg0, %c0_i32 : i32, i32
  }
  func.func @transform_1(%arg0: i32) -> (i32, i32) {
    %c0_i32 = arith.constant 0 : i32
    %c0_i32_0 = arith.constant 0 : i32
    %c0_i32_1 = arith.constant 0 : i32
    return %c0_i32, %c0_i32_0 : i32, i32
  }
  func.func @transform_2(%arg0: i32) -> (i32, i32) {
    %c0_i32 = arith.constant 0 : i32
    %c0_i32_0 = arith.constant 0 : i32
    %c0_i32_1 = arith.constant 0 : i32
    return %c0_i32, %c0_i32_0 : i32, i32
  }
  func.func @transform_3(%arg0: i32) -> (i32, i32) {
    %c0_i32 = arith.constant 0 : i32
    %c0_i32_0 = arith.constant 0 : i32
    %c0_i32_1 = arith.constant 0 : i32
    return %c0_i32, %c0_i32_0 : i32, i32
  }
  func.func @transform_4(%arg0: i32) -> (i32, i32) {
    %c0_i32 = arith.constant 0 : i32
    %c0_i32_0 = arith.constant 0 : i32
    %c0_i32_1 = arith.constant 0 : i32
    return %c0_i32, %c0_i32_0 : i32, i32
  }
  func.func @transform_5(%arg0: i32) -> (i32, i32) {
    %c0_i32 = arith.constant 0 : i32
    %c0_i32_0 = arith.constant 0 : i32
    %c0_i32_1 = arith.constant 0 : i32
    return %c0_i32, %c0_i32_0 : i32, i32
  }
  func.func @transform_6(%arg0: i32) -> (i32, i32) {
    %c0_i32 = arith.constant 0 : i32
    %c0_i32_0 = arith.constant 0 : i32
    %c0_i32_1 = arith.constant 0 : i32
    return %c0_i32, %c0_i32_0 : i32, i32
  }
  func.func @transform_7(%arg0: i32) -> (i32, i32) {
    %c0_i32 = arith.constant 0 : i32
    %c0_i32_0 = arith.constant 0 : i32
    return %arg0, %c0_i32 : i32, i32
  }
}

</mosaic_0001>

<bundles_post_ra>
// kernel: lenet_forward.3
= control target key start
LH: loop header
LB: loop body
LE: loop exit
PB: predicated region body
PF: predicated region fallthrough
CT: control target
= control target key end

     0   :  { %s2143_s1 = inlined_call_operand.vmem [shape: bf16[4,128,128], index: 1, kind: input, shape index: {}]   ;;  %s2144_s0 = inlined_call_operand.vmem [shape: bf16[392,128], index: 0, kind: input, shape index: {}]   ;;  %s2145_s2 = inlined_call_operand.vmem [shape: f32[1,128], index: 2, kind: input, shape index: {}]   ;;  %s2146_s3 = inlined_call_operand.vmem [shape: bf16[392,128], index: 3, kind: output, shape index: {}]  }
   0x1   :  { %v1656_v0 = vld [vmem:[%s2143_s1 + $0x38] sm:$0xff]  ;;  %v1655_v4 = vld [vmem:[%s2143_s1 + $0x30] sm:$0xff]  ;;  %v1654_v8 = vld [vmem:[%s2143_s1 + $0x28] sm:$0xff] }
   0x2   :  { %v1664_v1 = vld [vmem:[%s2143_s1 + $0x78] sm:$0xff]  ;;  %275 = vmatpush.bf16.msra.mxu0 %v1656_v0  ;;  %v1663_v5 = vld [vmem:[%s2143_s1 + $0x70] sm:$0xff]  ;;  %v1662_v9 = vld [vmem:[%s2143_s1 + $0x68] sm:$0xff] }
   0x3   :  { %v1672_v2 = vld [vmem:[%s2143_s1 + $0xb8] sm:$0xff]  ;;  %473 = vmatpush.bf16.msra.mxu1 %v1664_v1  ;;  %v1671_v6 = vld [vmem:[%s2143_s1 + $0xb0] sm:$0xff]  ;;  %v1670_v10 = vld [vmem:[%s2143_s1 + $0xa8] sm:$0xff] }
   0x4   :  { %v1680_v3 = vld [vmem:[%s2143_s1 + $0xf8] sm:$0xff]  ;;  %720 = vmatpush.bf16.msra.mxu2 %v1672_v2  ;;  %v1679_v7 = vld [vmem:[%s2143_s1 + $0xf0] sm:$0xff]  ;;  %v1678_v11 = vld [vmem:[%s2143_s1 + $0xe8] sm:$0xff] }
   0x5   :  { %967 = vmatpush.bf16.msra.mxu3 %v1680_v3  ;;  %v1653_v12 = vld [vmem:[%s2143_s1 + $0x20] sm:$0xff]  ;;  %v1652_v16 = vld [vmem:[%s2143_s1 + $0x18] sm:$0xff]  ;;  %v1651_v20 = vld [vmem:[%s2143_s1 + $0x10] sm:$0xff] }
   0x6   :  { %276 = vmatpush.bf16.msra.mxu0 %v1655_v4  ;;  %v1661_v13 = vld [vmem:[%s2143_s1 + $0x60] sm:$0xff]  ;;  %v1660_v17 = vld [vmem:[%s2143_s1 + $0x58] sm:$0xff]  ;;  %v1659_v21 = vld [vmem:[%s2143_s1 + $0x50] sm:$0xff] }
   0x7   :  { %474 = vmatpush.bf16.msra.mxu1 %v1663_v5  ;;  %v1669_v14 = vld [vmem:[%s2143_s1 + $0xa0] sm:$0xff]  ;;  %v1668_v18 = vld [vmem:[%s2143_s1 + $0x98] sm:$0xff]  ;;  %v1667_v22 = vld [vmem:[%s2143_s1 + $0x90] sm:$0xff] }
   0x8   :  { %721 = vmatpush.bf16.msra.mxu2 %v1671_v6  ;;  %v1677_v15 = vld [vmem:[%s2143_s1 + $0xe0] sm:$0xff]  ;;  %v1676_v19 = vld [vmem:[%s2143_s1 + $0xd8] sm:$0xff]  ;;  %v1675_v23 = vld [vmem:[%s2143_s1 + $0xd0] sm:$0xff] }
   0x9   :  { %968 = vmatpush.bf16.msra.mxu3 %v1679_v7  ;;  %v1650_v24 = vld [vmem:[%s2143_s1 + $0x8] sm:$0xff]  ;;  %v1649_v28 = vld [vmem:[%s2143_s1] sm:$0xff]  ;;  %v1627_v34 = vld [vmem:[%s2144_s0 + $0x10] sm:$0xff] }
   0xa   :  { %277 = vmatpush.bf16.msra.mxu0 %v1654_v8  ;;  %v1658_v25 = vld [vmem:[%s2143_s1 + $0x48] sm:$0xff]  ;;  %v1657_v29 = vld [vmem:[%s2143_s1 + $0x40] sm:$0xff]  ;;  %v1628_v35 = vld [vmem:[%s2144_s0 + $0x18] sm:$0xff] }
   0xb   :  { %475 = vmatpush.bf16.msra.mxu1 %v1662_v9  ;;  %v1666_v26 = vld [vmem:[%s2143_s1 + $0x88] sm:$0xff]  ;;  %v1665_v30 = vld [vmem:[%s2143_s1 + $0x80] sm:$0xff]  ;;  %v1631_v38 = vld [vmem:[%s2144_s0 + $0x30] sm:$0xff] }
   0xc   :  { %722 = vmatpush.bf16.msra.mxu2 %v1670_v10  ;;  %v1674_v27 = vld [vmem:[%s2143_s1 + $0xc8] sm:$0xff]  ;;  %v1673_v31 = vld [vmem:[%s2143_s1 + $0xc0] sm:$0xff]  ;;  %v1632_v39 = vld [vmem:[%s2144_s0 + $0x38] sm:$0xff] }
   0xd   :  { %969 = vmatpush.bf16.msra.mxu3 %v1678_v11  ;;  %v1625_v32 = vld [vmem:[%s2144_s0] sm:$0xff]  ;;  %v1626_v33 = vld [vmem:[%s2144_s0 + $0x8] sm:$0xff]  ;;  %v1635_v10 = vld [vmem:[%s2144_s0 + $0x50] sm:$0xff] }
   0xe   :  { %278 = vmatpush.bf16.msra.mxu0 %v1653_v12  ;;  %v1629_v36 = vld [vmem:[%s2144_s0 + $0x20] sm:$0xff]  ;;  %v1630_v37 = vld [vmem:[%s2144_s0 + $0x28] sm:$0xff] }
   0xf   :  { %476 = vmatpush.bf16.msra.mxu1 %v1661_v13  ;;  %v1633_v40 = vld [vmem:[%s2144_s0 + $0x40] sm:$0xff]  ;;  %v1634_v54 = vld [vmem:[%s2144_s0 + $0x48] sm:$0xff] }
  0x10   :  { %723 = vmatpush.bf16.msra.mxu2 %v1669_v14  ;;  %v1972_v50 = vld [vmem:[%s2145_s2] ss:$0 sm:$0xff] }
  0x11   :  { %970 = vmatpush.bf16.msra.mxu3 %v1677_v15 }
  0x12   :  { %279 = vmatpush.bf16.msra.mxu0 %v1652_v16 }
  0x13   :  { %477 = vmatpush.bf16.msra.mxu1 %v1660_v17 }
  0x14   :  { %724 = vmatpush.bf16.msra.mxu2 %v1668_v18 }
  0x15   :  { %971 = vmatpush.bf16.msra.mxu3 %v1676_v19 }
  0x16   :  { %280 = vmatpush.bf16.msra.mxu0 %v1651_v20 }
  0x17   :  { %478 = vmatpush.bf16.msra.mxu1 %v1659_v21 }
  0x18   :  { %725 = vmatpush.bf16.msra.mxu2 %v1667_v22 }
  0x19   :  { %972 = vmatpush.bf16.msra.mxu3 %v1675_v23 }
  0x1a   :  { %281 = vmatpush.bf16.msra.mxu0 %v1650_v24 }
  0x1b   :  { %479 = vmatpush.bf16.msra.mxu1 %v1658_v25 }
  0x1c   :  { %726 = vmatpush.bf16.msra.mxu2 %v1666_v26 }
  0x1d   :  { %973 = vmatpush.bf16.msra.mxu3 %v1674_v27 }
  0x1e   :  { %282 = vmatpush.bf16.msra.mxu0 %v1649_v28 }
  0x1f   :  { %480 = vmatpush.bf16.msra.mxu1 %v1657_v29 }
  0x20   :  { %727 = vmatpush.bf16.msra.mxu2 %v1665_v30  ;;  %v1636_v30 = vld [vmem:[%s2144_s0 + $0x58] sm:$0xff] }
  0x21   :  { %974 = vmatpush.bf16.msra.mxu3 %v1673_v31  ;;  %283 = vmatmul.bf16.vlgmr.msra.gmra.mxu0 %v1625_v32 }
  0x22   :  { %481 = vmatmul.bf16.vlgmr.msra.gmra.mxu1 %v1625_v32 }
  0x23   :  { %728 = vmatmul.bf16.vlgmr.msra.gmra.mxu2 %v1625_v32 }
  0x24   :  { %975 = vmatmul.bf16.vlgmr.msra.gmra.mxu3 %v1625_v32 }
  0x31   :  { %288 = vmatmul.bf16.gmra.mxu0 %v1626_v33 }
  0x32   :  { %486 = vmatmul.bf16.gmra.mxu1 %v1626_v33 }
  0x33   :  { %733 = vmatmul.bf16.gmra.mxu2 %v1626_v33 }
  0x34   :  { %980 = vmatmul.bf16.gmra.mxu3 %v1626_v33 }
  0x41   :  { %293 = vmatmul.bf16.gmra.mxu0 %v1627_v34 }
  0x42   :  { %491 = vmatmul.bf16.gmra.mxu1 %v1627_v34 }
  0x43   :  { %738 = vmatmul.bf16.gmra.mxu2 %v1627_v34 }
  0x44   :  { %985 = vmatmul.bf16.gmra.mxu3 %v1627_v34 }
  0x51   :  { %298 = vmatmul.bf16.gmra.mxu0 %v1628_v35 }
  0x52   :  { %496 = vmatmul.bf16.gmra.mxu1 %v1628_v35 }
  0x53   :  { %743 = vmatmul.bf16.gmra.mxu2 %v1628_v35 }
  0x54   :  { %990 = vmatmul.bf16.gmra.mxu3 %v1628_v35 }
  0x61   :  { %303 = vmatmul.bf16.gmra.mxu0 %v1629_v36 }
  0x62   :  { %501 = vmatmul.bf16.gmra.mxu1 %v1629_v36 }
  0x63   :  { %748 = vmatmul.bf16.gmra.mxu2 %v1629_v36 }
  0x64   :  { %995 = vmatmul.bf16.gmra.mxu3 %v1629_v36 }
  0x71   :  { %308 = vmatmul.bf16.gmra.mxu0 %v1630_v37 }
  0x72   :  { %506 = vmatmul.bf16.gmra.mxu1 %v1630_v37 }
  0x73   :  { %753 = vmatmul.bf16.gmra.mxu2 %v1630_v37 }
  0x74   :  { %1000 = vmatmul.bf16.gmra.mxu3 %v1630_v37 }
  0x81   :  { %313 = vmatmul.bf16.gmra.mxu0 %v1631_v38 }
  0x82   :  { %511 = vmatmul.bf16.gmra.mxu1 %v1631_v38 }
  0x83   :  { %758 = vmatmul.bf16.gmra.mxu2 %v1631_v38 }
  0x84   :  { %1005 = vmatmul.bf16.gmra.mxu3 %v1631_v38 }
  0x91   :  { %318 = vmatmul.bf16.gmra.mxu0 %v1632_v39 }
  0x92   :  { %516 = vmatmul.bf16.gmra.mxu1 %v1632_v39 }
  0x93   :  { %763 = vmatmul.bf16.gmra.mxu2 %v1632_v39 }
  0x94   :  { %1010 = vmatmul.bf16.gmra.mxu3 %v1632_v39 }
  0x9e   :  { %v284_v41 = vpop.f32.mrf.mxu0 }
  0x9f   :  { %v482_v42 = vpop.f32.mrf.mxu1 }
  0xa0   :  { %v606_v43 = vmax.f32 %v284_v41, %v482_v42 }
  0xa1   :  { %323 = vmatmul.bf16.gmra.mxu0 %v1633_v40 }
  0xa2   :  { %521 = vmatmul.bf16.gmra.mxu1 %v1633_v40 }
  0xa3   :  { %768 = vmatmul.bf16.gmra.mxu2 %v1633_v40 }
  0xa4   :  { %1015 = vmatmul.bf16.gmra.mxu3 %v1633_v40 }
  0xa6   :  { %v729_v44 = vpop.f32.mrf.mxu2  ;;  %v286_v46 = vpop.f32.mrf.mxu0 }
  0xa7   :  { %v976_v45 = vpop.f32.mrf.mxu3  ;;  %v484_v47 = vpop.f32.mrf.mxu1  ;;  %v853_v48 = vmax.f32 %v606_v43, %v729_v44 }
  0xa8   :  { %v607_v51 = vmax.f32 %v286_v46, %v484_v47 }
  0xa9   :  { %v1100_v49 = vmax.f32 %v853_v48, %v976_v45 }
  0xab   :  { %v1153_v58 = vadd.f32 %v1972_v50, %v1100_v49 }
  0xad   :  { %v1202_v61 = vmax.f32 %v1153_v58, 0.0 }
  0xae   :  { %v731_v52 = vpop.f32.mrf.mxu2  ;;  %v289_v56 = vpop.f32.mrf.mxu0 }
  0xaf   :  { %v978_v53 = vpop.f32.mrf.mxu3  ;;  %v854_v55 = vmax.f32 %v607_v51, %v731_v52  ;;  %v487_v57 = vpop.f32.mrf.mxu1  ;;  %v1637_v51 = vld [vmem:[%s2144_s0 + $0x60] sm:$0xff] }
  0xb0   :  { %v608_v63 = vmax.f32 %v289_v56, %v487_v57 }
  0xb1   :  { %v1101_v59 = vmax.f32 %v854_v55, %v978_v53  ;;  %328 = vmatmul.bf16.gmra.mxu0 %v1634_v54 }
  0xb2   :  { %526 = vmatmul.bf16.gmra.mxu1 %v1634_v54 }
  0xb3   :  { %v1154_v60 = vadd.f32 %v1972_v50, %v1101_v59  ;;  %773 = vmatmul.bf16.gmra.mxu2 %v1634_v54 }
  0xb4   :  { %1020 = vmatmul.bf16.gmra.mxu3 %v1634_v54 }
  0xb5   :  { %v1203_v62 = vmax.f32 %v1154_v60, 0.0 }
  0xb6   :  { %v734_v0 = vpop.f32.mrf.mxu2  ;;  %v291_v3 = vpop.f32.mrf.mxu0 }
  0xb7   :  { %v981_v1 = vpop.f32.mrf.mxu3  ;;  %v1684_v2 = vpack.c.bf16 %v1203_v62, %v1202_v61  ;;  %v489_v4 = vpop.f32.mrf.mxu1  ;;  %v855_v5 = vmax.f32 %v608_v63, %v734_v0 }
  0xb8   :  { %v609_v7 = vmax.f32 %v291_v3, %v489_v4 }
  0xb9   :  { %1685 = vst [vmem:[%s2146_s3] sm:$0xff] %v1684_v2   ;;  %v1102_v6 = vmax.f32 %v855_v5, %v981_v1 }
  0xbb   :  { %v1155_v14 = vadd.f32 %v1972_v50, %v1102_v6 }
  0xbd   :  { %v1204_v17 = vmax.f32 %v1155_v14, 0.0 }
  0xbe   :  { %v736_v8 = vpop.f32.mrf.mxu2  ;;  %v294_v12 = vpop.f32.mrf.mxu0 }
  0xbf   :  { %v983_v9 = vpop.f32.mrf.mxu3  ;;  %v856_v11 = vmax.f32 %v609_v7, %v736_v8  ;;  %v492_v13 = vpop.f32.mrf.mxu1  ;;  %v1638_v7 = vld [vmem:[%s2144_s0 + $0x68] sm:$0xff] }
  0xc0   :  { %v610_v19 = vmax.f32 %v294_v12, %v492_v13 }
  0xc1   :  { %v1103_v15 = vmax.f32 %v856_v11, %v983_v9  ;;  %333 = vmatmul.bf16.gmra.mxu0 %v1635_v10 }
  0xc2   :  { %531 = vmatmul.bf16.gmra.mxu1 %v1635_v10 }
  0xc3   :  { %v1156_v16 = vadd.f32 %v1972_v50, %v1103_v15  ;;  %778 = vmatmul.bf16.gmra.mxu2 %v1635_v10 }
  0xc4   :  { %1025 = vmatmul.bf16.gmra.mxu3 %v1635_v10 }
  0xc5   :  { %v1205_v18 = vmax.f32 %v1156_v16, 0.0 }
  0xc6   :  { %v739_v20 = vpop.f32.mrf.mxu2  ;;  %v296_v23 = vpop.f32.mrf.mxu0 }
  0xc7   :  { %v986_v21 = vpop.f32.mrf.mxu3  ;;  %v1689_v22 = vpack.c.bf16 %v1205_v18, %v1204_v17  ;;  %v494_v24 = vpop.f32.mrf.mxu1  ;;  %v857_v25 = vmax.f32 %v610_v19, %v739_v20 }
  0xc8   :  { %v611_v27 = vmax.f32 %v296_v23, %v494_v24 }
  0xc9   :  { %1801 = vst [vmem:[%s2146_s3 + $0x8] sm:$0xff] %v1689_v22   ;;  %v1104_v26 = vmax.f32 %v857_v25, %v986_v21 }
  0xcb   :  { %v1157_v34 = vadd.f32 %v1972_v50, %v1104_v26 }
  0xcd   :  { %v1206_v37 = vmax.f32 %v1157_v34, 0.0 }
  0xce   :  { %v741_v28 = vpop.f32.mrf.mxu2  ;;  %v299_v32 = vpop.f32.mrf.mxu0 }
  0xcf   :  { %v988_v29 = vpop.f32.mrf.mxu3  ;;  %v858_v31 = vmax.f32 %v611_v27, %v741_v28  ;;  %v497_v33 = vpop.f32.mrf.mxu1  ;;  %v1639_v27 = vld [vmem:[%s2144_s0 + $0x70] sm:$0xff] }
  0xd0   :  { %v612_v39 = vmax.f32 %v299_v32, %v497_v33 }
  0xd1   :  { %v1105_v35 = vmax.f32 %v858_v31, %v988_v29  ;;  %338 = vmatmul.bf16.gmra.mxu0 %v1636_v30 }
  0xd2   :  { %536 = vmatmul.bf16.gmra.mxu1 %v1636_v30 }
  0xd3   :  { %v1158_v36 = vadd.f32 %v1972_v50, %v1105_v35  ;;  %783 = vmatmul.bf16.gmra.mxu2 %v1636_v30 }
  0xd4   :  { %1030 = vmatmul.bf16.gmra.mxu3 %v1636_v30 }
  0xd5   :  { %v1207_v38 = vmax.f32 %v1158_v36, 0.0 }
  0xd6   :  { %v744_v40 = vpop.f32.mrf.mxu2  ;;  %v301_v43 = vpop.f32.mrf.mxu0 }
  0xd7   :  { %v991_v41 = vpop.f32.mrf.mxu3  ;;  %v1694_v42 = vpack.c.bf16 %v1207_v38, %v1206_v37  ;;  %v499_v44 = vpop.f32.mrf.mxu1  ;;  %v859_v45 = vmax.f32 %v612_v39, %v744_v40 }
  0xd8   :  { %v613_v47 = vmax.f32 %v301_v43, %v499_v44 }
  0xd9   :  { %1802 = vst [vmem:[%s2146_s3 + $0x10] sm:$0xff] %v1694_v42   ;;  %v1106_v46 = vmax.f32 %v859_v45, %v991_v41 }
  0xdb   :  { %v1159_v55 = vadd.f32 %v1972_v50, %v1106_v46 }
  0xdd   :  { %v1208_v58 = vmax.f32 %v1159_v55, 0.0 }
  0xde   :  { %v746_v48 = vpop.f32.mrf.mxu2  ;;  %v304_v53 = vpop.f32.mrf.mxu0 }
  0xdf   :  { %v993_v49 = vpop.f32.mrf.mxu3  ;;  %v860_v52 = vmax.f32 %v613_v47, %v746_v48  ;;  %v502_v54 = vpop.f32.mrf.mxu1  ;;  %v1640_v47 = vld [vmem:[%s2144_s0 + $0x78] sm:$0xff] }
  0xe0   :  { %v614_v60 = vmax.f32 %v304_v53, %v502_v54 }
  0xe1   :  { %v1107_v56 = vmax.f32 %v860_v52, %v993_v49  ;;  %343 = vmatmul.bf16.gmra.mxu0 %v1637_v51 }
  0xe2   :  { %541 = vmatmul.bf16.gmra.mxu1 %v1637_v51 }
  0xe3   :  { %v1160_v57 = vadd.f32 %v1972_v50, %v1107_v56  ;;  %788 = vmatmul.bf16.gmra.mxu2 %v1637_v51 }
  0xe4   :  { %1035 = vmatmul.bf16.gmra.mxu3 %v1637_v51 }
  0xe5   :  { %v1209_v59 = vmax.f32 %v1160_v57, 0.0 }
  0xe6   :  { %v749_v61 = vpop.f32.mrf.mxu2  ;;  %v306_v0 = vpop.f32.mrf.mxu0 }
  0xe7   :  { %v996_v62 = vpop.f32.mrf.mxu3  ;;  %v1699_v63 = vpack.c.bf16 %v1209_v59, %v1208_v58  ;;  %v504_v1 = vpop.f32.mrf.mxu1  ;;  %v861_v2 = vmax.f32 %v614_v60, %v749_v61 }
  0xe8   :  { %v615_v4 = vmax.f32 %v306_v0, %v504_v1 }
  0xe9   :  { %1803 = vst [vmem:[%s2146_s3 + $0x18] sm:$0xff] %v1699_v63   ;;  %v1108_v3 = vmax.f32 %v861_v2, %v996_v62 }
  0xeb   :  { %v1161_v11 = vadd.f32 %v1972_v50, %v1108_v3 }
  0xed   :  { %v1210_v14 = vmax.f32 %v1161_v11, 0.0 }
  0xee   :  { %v751_v5 = vpop.f32.mrf.mxu2  ;;  %v309_v9 = vpop.f32.mrf.mxu0 }
  0xef   :  { %v998_v6 = vpop.f32.mrf.mxu3  ;;  %v862_v8 = vmax.f32 %v615_v4, %v751_v5  ;;  %v507_v10 = vpop.f32.mrf.mxu1  ;;  %v1641_v4 = vld [vmem:[%s2144_s0 + $0x80] sm:$0xff] }
  0xf0   :  { %v616_v16 = vmax.f32 %v309_v9, %v507_v10 }
  0xf1   :  { %v1109_v12 = vmax.f32 %v862_v8, %v998_v6  ;;  %348 = vmatmul.bf16.gmra.mxu0 %v1638_v7 }
  0xf2   :  { %546 = vmatmul.bf16.gmra.mxu1 %v1638_v7 }
  0xf3   :  { %v1162_v13 = vadd.f32 %v1972_v50, %v1109_v12  ;;  %793 = vmatmul.bf16.gmra.mxu2 %v1638_v7 }
  0xf4   :  { %1040 = vmatmul.bf16.gmra.mxu3 %v1638_v7 }
  0xf5   :  { %v1211_v15 = vmax.f32 %v1162_v13, 0.0 }
  0xf6   :  { %v754_v17 = vpop.f32.mrf.mxu2  ;;  %v311_v20 = vpop.f32.mrf.mxu0 }
  0xf7   :  { %v1001_v18 = vpop.f32.mrf.mxu3  ;;  %v1704_v19 = vpack.c.bf16 %v1211_v15, %v1210_v14  ;;  %v509_v21 = vpop.f32.mrf.mxu1  ;;  %v863_v22 = vmax.f32 %v616_v16, %v754_v17 }
  0xf8   :  { %v617_v24 = vmax.f32 %v311_v20, %v509_v21 }
  0xf9   :  { %1804 = vst [vmem:[%s2146_s3 + $0x20] sm:$0xff] %v1704_v19   ;;  %v1110_v23 = vmax.f32 %v863_v22, %v1001_v18 }
  0xfb   :  { %v1163_v31 = vadd.f32 %v1972_v50, %v1110_v23 }
  0xfd   :  { %v1212_v34 = vmax.f32 %v1163_v31, 0.0 }
  0xfe   :  { %v756_v25 = vpop.f32.mrf.mxu2  ;;  %v314_v29 = vpop.f32.mrf.mxu0 }
  0xff   :  { %v1003_v26 = vpop.f32.mrf.mxu3  ;;  %v864_v28 = vmax.f32 %v617_v24, %v756_v25  ;;  %v512_v30 = vpop.f32.mrf.mxu1  ;;  %v1642_v24 = vld [vmem:[%s2144_s0 + $0x88] sm:$0xff] }
 0x100   :  { %v618_v36 = vmax.f32 %v314_v29, %v512_v30 }
 0x101   :  { %v1111_v32 = vmax.f32 %v864_v28, %v1003_v26  ;;  %353 = vmatmul.bf16.gmra.mxu0 %v1639_v27 }
 0x102   :  { %551 = vmatmul.bf16.gmra.mxu1 %v1639_v27 }
 0x103   :  { %v1164_v33 = vadd.f32 %v1972_v50, %v1111_v32  ;;  %798 = vmatmul.bf16.gmra.mxu2 %v1639_v27 }
 0x104   :  { %1045 = vmatmul.bf16.gmra.mxu3 %v1639_v27 }
 0x105   :  { %v1213_v35 = vmax.f32 %v1164_v33, 0.0 }
 0x106   :  { %v759_v37 = vpop.f32.mrf.mxu2  ;;  %v316_v40 = vpop.f32.mrf.mxu0 }
 0x107   :  { %v1006_v38 = vpop.f32.mrf.mxu3  ;;  %v1709_v39 = vpack.c.bf16 %v1213_v35, %v1212_v34  ;;  %v514_v41 = vpop.f32.mrf.mxu1  ;;  %v865_v42 = vmax.f32 %v618_v36, %v759_v37 }
 0x108   :  { %v619_v44 = vmax.f32 %v316_v40, %v514_v41 }
 0x109   :  { %1805 = vst [vmem:[%s2146_s3 + $0x28] sm:$0xff] %v1709_v39   ;;  %v1112_v43 = vmax.f32 %v865_v42, %v1006_v38 }
 0x10b   :  { %v1165_v52 = vadd.f32 %v1972_v50, %v1112_v43 }
 0x10d   :  { %v1214_v55 = vmax.f32 %v1165_v52, 0.0 }
 0x10e   :  { %v761_v45 = vpop.f32.mrf.mxu2  ;;  %v319_v49 = vpop.f32.mrf.mxu0 }
 0x10f   :  { %v1008_v46 = vpop.f32.mrf.mxu3  ;;  %v866_v48 = vmax.f32 %v619_v44, %v761_v45  ;;  %v517_v51 = vpop.f32.mrf.mxu1  ;;  %v1643_v44 = vld [vmem:[%s2144_s0 + $0x90] sm:$0xff] }
 0x110   :  { %v620_v57 = vmax.f32 %v319_v49, %v517_v51 }
 0x111   :  { %v1113_v53 = vmax.f32 %v866_v48, %v1008_v46  ;;  %358 = vmatmul.bf16.gmra.mxu0 %v1640_v47 }
 0x112   :  { %556 = vmatmul.bf16.gmra.mxu1 %v1640_v47 }
 0x113   :  { %v1166_v54 = vadd.f32 %v1972_v50, %v1113_v53  ;;  %803 = vmatmul.bf16.gmra.mxu2 %v1640_v47 }
 0x114   :  { %1050 = vmatmul.bf16.gmra.mxu3 %v1640_v47 }
 0x115   :  { %v1215_v56 = vmax.f32 %v1166_v54, 0.0 }
 0x116   :  { %v764_v58 = vpop.f32.mrf.mxu2  ;;  %v321_v61 = vpop.f32.mrf.mxu0 }
 0x117   :  { %v1011_v59 = vpop.f32.mrf.mxu3  ;;  %v1714_v60 = vpack.c.bf16 %v1215_v56, %v1214_v55  ;;  %v519_v62 = vpop.f32.mrf.mxu1  ;;  %v867_v63 = vmax.f32 %v620_v57, %v764_v58 }
 0x118   :  { %v621_v1 = vmax.f32 %v321_v61, %v519_v62 }
 0x119   :  { %1806 = vst [vmem:[%s2146_s3 + $0x30] sm:$0xff] %v1714_v60   ;;  %v1114_v0 = vmax.f32 %v867_v63, %v1011_v59 }
 0x11b   :  { %v1167_v8 = vadd.f32 %v1972_v50, %v1114_v0 }
 0x11d   :  { %v1216_v11 = vmax.f32 %v1167_v8, 0.0 }
 0x11e   :  { %v766_v2 = vpop.f32.mrf.mxu2  ;;  %v324_v6 = vpop.f32.mrf.mxu0 }
 0x11f   :  { %v1013_v3 = vpop.f32.mrf.mxu3  ;;  %v868_v5 = vmax.f32 %v621_v1, %v766_v2  ;;  %v522_v7 = vpop.f32.mrf.mxu1  ;;  %v1644_v1 = vld [vmem:[%s2144_s0 + $0x98] sm:$0xff] }
 0x120   :  { %v622_v13 = vmax.f32 %v324_v6, %v522_v7 }
 0x121   :  { %v1115_v9 = vmax.f32 %v868_v5, %v1013_v3  ;;  %363 = vmatmul.bf16.gmra.mxu0 %v1641_v4 }
 0x122   :  { %561 = vmatmul.bf16.gmra.mxu1 %v1641_v4 }
 0x123   :  { %v1168_v10 = vadd.f32 %v1972_v50, %v1115_v9  ;;  %808 = vmatmul.bf16.gmra.mxu2 %v1641_v4 }
 0x124   :  { %1055 = vmatmul.bf16.gmra.mxu3 %v1641_v4 }
 0x125   :  { %v1217_v12 = vmax.f32 %v1168_v10, 0.0 }
 0x126   :  { %v769_v14 = vpop.f32.mrf.mxu2  ;;  %v326_v17 = vpop.f32.mrf.mxu0 }
 0x127   :  { %v1016_v15 = vpop.f32.mrf.mxu3  ;;  %v1719_v16 = vpack.c.bf16 %v1217_v12, %v1216_v11  ;;  %v524_v18 = vpop.f32.mrf.mxu1  ;;  %v869_v19 = vmax.f32 %v622_v13, %v769_v14 }
 0x128   :  { %v623_v21 = vmax.f32 %v326_v17, %v524_v18 }
 0x129   :  { %1807 = vst [vmem:[%s2146_s3 + $0x38] sm:$0xff] %v1719_v16   ;;  %v1116_v20 = vmax.f32 %v869_v19, %v1016_v15 }
 0x12b   :  { %v1169_v28 = vadd.f32 %v1972_v50, %v1116_v20 }
 0x12d   :  { %v1218_v31 = vmax.f32 %v1169_v28, 0.0 }
 0x12e   :  { %v771_v22 = vpop.f32.mrf.mxu2  ;;  %v329_v26 = vpop.f32.mrf.mxu0 }
 0x12f   :  { %v1018_v23 = vpop.f32.mrf.mxu3  ;;  %v870_v25 = vmax.f32 %v623_v21, %v771_v22  ;;  %v527_v27 = vpop.f32.mrf.mxu1  ;;  %v1645_v21 = vld [vmem:[%s2144_s0 + $0xa0] sm:$0xff] }
 0x130   :  { %v624_v33 = vmax.f32 %v329_v26, %v527_v27 }
 0x131   :  { %v1117_v29 = vmax.f32 %v870_v25, %v1018_v23  ;;  %368 = vmatmul.bf16.gmra.mxu0 %v1642_v24 }
 0x132   :  { %566 = vmatmul.bf16.gmra.mxu1 %v1642_v24 }
 0x133   :  { %v1170_v30 = vadd.f32 %v1972_v50, %v1117_v29  ;;  %813 = vmatmul.bf16.gmra.mxu2 %v1642_v24 }
 0x134   :  { %1060 = vmatmul.bf16.gmra.mxu3 %v1642_v24 }
 0x135   :  { %v1219_v32 = vmax.f32 %v1170_v30, 0.0 }
 0x136   :  { %v774_v34 = vpop.f32.mrf.mxu2  ;;  %v331_v37 = vpop.f32.mrf.mxu0 }
 0x137   :  { %v1021_v35 = vpop.f32.mrf.mxu3  ;;  %v1724_v36 = vpack.c.bf16 %v1219_v32, %v1218_v31  ;;  %v529_v38 = vpop.f32.mrf.mxu1  ;;  %v871_v39 = vmax.f32 %v624_v33, %v774_v34 }
 0x138   :  { %v625_v41 = vmax.f32 %v331_v37, %v529_v38 }
 0x139   :  { %1808 = vst [vmem:[%s2146_s3 + $0x40] sm:$0xff] %v1724_v36   ;;  %v1118_v40 = vmax.f32 %v871_v39, %v1021_v35 }
 0x13b   :  { %v1171_v48 = vadd.f32 %v1972_v50, %v1118_v40 }
 0x13d   :  { %v1220_v52 = vmax.f32 %v1171_v48, 0.0 }
 0x13e   :  { %v776_v42 = vpop.f32.mrf.mxu2  ;;  %v334_v46 = vpop.f32.mrf.mxu0 }
 0x13f   :  { %v1023_v43 = vpop.f32.mrf.mxu3  ;;  %v872_v45 = vmax.f32 %v625_v41, %v776_v42  ;;  %v532_v47 = vpop.f32.mrf.mxu1  ;;  %v1646_v41 = vld [vmem:[%s2144_s0 + $0xa8] sm:$0xff] }
 0x140   :  { %v626_v54 = vmax.f32 %v334_v46, %v532_v47 }
 0x141   :  { %v1119_v49 = vmax.f32 %v872_v45, %v1023_v43  ;;  %373 = vmatmul.bf16.gmra.mxu0 %v1643_v44 }
 0x142   :  { %571 = vmatmul.bf16.gmra.mxu1 %v1643_v44 }
 0x143   :  { %v1172_v51 = vadd.f32 %v1972_v50, %v1119_v49  ;;  %818 = vmatmul.bf16.gmra.mxu2 %v1643_v44 }
 0x144   :  { %1065 = vmatmul.bf16.gmra.mxu3 %v1643_v44 }
 0x145   :  { %v1221_v53 = vmax.f32 %v1172_v51, 0.0 }
 0x146   :  { %v779_v55 = vpop.f32.mrf.mxu2  ;;  %v336_v58 = vpop.f32.mrf.mxu0 }
 0x147   :  { %v1026_v56 = vpop.f32.mrf.mxu3  ;;  %v1729_v57 = vpack.c.bf16 %v1221_v53, %v1220_v52  ;;  %v534_v59 = vpop.f32.mrf.mxu1  ;;  %v873_v60 = vmax.f32 %v626_v54, %v779_v55 }
 0x148   :  { %v627_v62 = vmax.f32 %v336_v58, %v534_v59 }
 0x149   :  { %1809 = vst [vmem:[%s2146_s3 + $0x48] sm:$0xff] %v1729_v57   ;;  %v1120_v61 = vmax.f32 %v873_v60, %v1026_v56 }
 0x14b   :  { %v1173_v5 = vadd.f32 %v1972_v50, %v1120_v61 }
 0x14d   :  { %v1222_v8 = vmax.f32 %v1173_v5, 0.0 }
 0x14e   :  { %v781_v63 = vpop.f32.mrf.mxu2  ;;  %v339_v3 = vpop.f32.mrf.mxu0 }
 0x14f   :  { %v1028_v0 = vpop.f32.mrf.mxu3  ;;  %v874_v2 = vmax.f32 %v627_v62, %v781_v63  ;;  %v537_v4 = vpop.f32.mrf.mxu1  ;;  %v1647_v62 = vld [vmem:[%s2144_s0 + $0xb0] sm:$0xff] }
 0x150   :  { %v628_v10 = vmax.f32 %v339_v3, %v537_v4 }
 0x151   :  { %v1121_v6 = vmax.f32 %v874_v2, %v1028_v0  ;;  %378 = vmatmul.bf16.gmra.mxu0 %v1644_v1 }
 0x152   :  { %576 = vmatmul.bf16.gmra.mxu1 %v1644_v1 }
 0x153   :  { %v1174_v7 = vadd.f32 %v1972_v50, %v1121_v6  ;;  %823 = vmatmul.bf16.gmra.mxu2 %v1644_v1 }
 0x154   :  { %1070 = vmatmul.bf16.gmra.mxu3 %v1644_v1 }
 0x155   :  { %v1223_v9 = vmax.f32 %v1174_v7, 0.0 }
 0x156   :  { %v784_v11 = vpop.f32.mrf.mxu2  ;;  %v341_v14 = vpop.f32.mrf.mxu0 }
 0x157   :  { %v1031_v12 = vpop.f32.mrf.mxu3  ;;  %v1734_v13 = vpack.c.bf16 %v1223_v9, %v1222_v8  ;;  %v539_v15 = vpop.f32.mrf.mxu1  ;;  %v875_v16 = vmax.f32 %v628_v10, %v784_v11 }
 0x158   :  { %v629_v18 = vmax.f32 %v341_v14, %v539_v15 }
 0x159   :  { %1810 = vst [vmem:[%s2146_s3 + $0x50] sm:$0xff] %v1734_v13   ;;  %v1122_v17 = vmax.f32 %v875_v16, %v1031_v12 }
 0x15b   :  { %v1175_v25 = vadd.f32 %v1972_v50, %v1122_v17 }
 0x15d   :  { %v1224_v28 = vmax.f32 %v1175_v25, 0.0 }
 0x15e   :  { %v786_v19 = vpop.f32.mrf.mxu2  ;;  %v344_v23 = vpop.f32.mrf.mxu0 }
 0x15f   :  { %v1033_v20 = vpop.f32.mrf.mxu3  ;;  %v876_v22 = vmax.f32 %v629_v18, %v786_v19  ;;  %v542_v24 = vpop.f32.mrf.mxu1  ;;  %v1648_v18 = vld [vmem:[%s2144_s0 + $0xb8] sm:$0xff] }
 0x160   :  { %v630_v30 = vmax.f32 %v344_v23, %v542_v24 }
 0x161   :  { %v1123_v26 = vmax.f32 %v876_v22, %v1033_v20  ;;  %383 = vmatmul.bf16.gmra.mxu0 %v1645_v21 }
 0x162   :  { %581 = vmatmul.bf16.gmra.mxu1 %v1645_v21 }
 0x163   :  { %v1176_v27 = vadd.f32 %v1972_v50, %v1123_v26  ;;  %828 = vmatmul.bf16.gmra.mxu2 %v1645_v21 }
 0x164   :  { %1075 = vmatmul.bf16.gmra.mxu3 %v1645_v21 }
 0x165   :  { %v1225_v29 = vmax.f32 %v1176_v27, 0.0 }
 0x166   :  { %v789_v31 = vpop.f32.mrf.mxu2  ;;  %v346_v34 = vpop.f32.mrf.mxu0 }
 0x167   :  { %v1036_v32 = vpop.f32.mrf.mxu3  ;;  %v1739_v33 = vpack.c.bf16 %v1225_v29, %v1224_v28  ;;  %v544_v35 = vpop.f32.mrf.mxu1  ;;  %v877_v36 = vmax.f32 %v630_v30, %v789_v31 }
 0x168   :  { %v631_v38 = vmax.f32 %v346_v34, %v544_v35 }
 0x169   :  { %1811 = vst [vmem:[%s2146_s3 + $0x58] sm:$0xff] %v1739_v33   ;;  %v1124_v37 = vmax.f32 %v877_v36, %v1036_v32  ;;  %v62_v33 = vld [vmem:[%s2144_s0 + $0xc0] sm:$0xf] }
 0x16a   :  { %v176_v35 = vunpack.c.l.b16 %v62_v33 }
 0x16b   :  { %v1177_v45 = vadd.f32 %v1972_v50, %v1124_v37 }
 0x16d   :  { %v1226_v48 = vmax.f32 %v1177_v45, 0.0 }
 0x16e   :  { %v791_v39 = vpop.f32.mrf.mxu2  ;;  %v349_v43 = vpop.f32.mrf.mxu0 }
 0x16f   :  { %v1038_v40 = vpop.f32.mrf.mxu3  ;;  %v878_v42 = vmax.f32 %v631_v38, %v791_v39  ;;  %v547_v44 = vpop.f32.mrf.mxu1 }
 0x170   :  { %v632_v51 = vmax.f32 %v349_v43, %v547_v44 }
 0x171   :  { %v1125_v46 = vmax.f32 %v878_v42, %v1038_v40  ;;  %388 = vmatmul.bf16.gmra.mxu0 %v1646_v41  ;;  %v201_v40 = vpack.c.b16 %v176_v35, %v176_v35 }
 0x172   :  { %586 = vmatmul.bf16.gmra.mxu1 %v1646_v41 }
 0x173   :  { %v1178_v47 = vadd.f32 %v1972_v50, %v1125_v46  ;;  %833 = vmatmul.bf16.gmra.mxu2 %v1646_v41 }
 0x174   :  { %1080 = vmatmul.bf16.gmra.mxu3 %v1646_v41 }
 0x175   :  { %v1227_v49 = vmax.f32 %v1178_v47, 0.0 }
 0x176   :  { %v794_v52 = vpop.f32.mrf.mxu2  ;;  %v351_v55 = vpop.f32.mrf.mxu0 }
 0x177   :  { %v1041_v53 = vpop.f32.mrf.mxu3  ;;  %v1744_v54 = vpack.c.bf16 %v1227_v49, %v1226_v48  ;;  %v549_v56 = vpop.f32.mrf.mxu1  ;;  %v879_v57 = vmax.f32 %v632_v51, %v794_v52 }
 0x178   :  { %v633_v59 = vmax.f32 %v351_v55, %v549_v56 }
 0x179   :  { %1812 = vst [vmem:[%s2146_s3 + $0x60] sm:$0xff] %v1744_v54   ;;  %v1126_v58 = vmax.f32 %v879_v57, %v1041_v53 }
 0x17b   :  { %v1179_v2 = vadd.f32 %v1972_v50, %v1126_v58 }
 0x17d   :  { %v1228_v5 = vmax.f32 %v1179_v2, 0.0 }
 0x17e   :  { %v796_v60 = vpop.f32.mrf.mxu2  ;;  %v354_v0 = vpop.f32.mrf.mxu0 }
 0x17f   :  { %v1043_v61 = vpop.f32.mrf.mxu3  ;;  %v880_v63 = vmax.f32 %v633_v59, %v796_v60  ;;  %v552_v1 = vpop.f32.mrf.mxu1 }
 0x180   :  { %v634_v7 = vmax.f32 %v354_v0, %v552_v1 }
 0x181   :  { %v1127_v3 = vmax.f32 %v880_v63, %v1043_v61  ;;  %393 = vmatmul.bf16.gmra.mxu0 %v1647_v62 }
 0x182   :  { %591 = vmatmul.bf16.gmra.mxu1 %v1647_v62 }
 0x183   :  { %v1180_v4 = vadd.f32 %v1972_v50, %v1127_v3  ;;  %838 = vmatmul.bf16.gmra.mxu2 %v1647_v62 }
 0x184   :  { %1085 = vmatmul.bf16.gmra.mxu3 %v1647_v62 }
 0x185   :  { %v1229_v6 = vmax.f32 %v1180_v4, 0.0 }
 0x186   :  { %v799_v8 = vpop.f32.mrf.mxu2  ;;  %v356_v11 = vpop.f32.mrf.mxu0 }
 0x187   :  { %v1046_v9 = vpop.f32.mrf.mxu3  ;;  %v1749_v10 = vpack.c.bf16 %v1229_v6, %v1228_v5  ;;  %v554_v12 = vpop.f32.mrf.mxu1  ;;  %v881_v13 = vmax.f32 %v634_v7, %v799_v8 }
 0x188   :  { %v635_v15 = vmax.f32 %v356_v11, %v554_v12 }
 0x189   :  { %1813 = vst [vmem:[%s2146_s3 + $0x68] sm:$0xff] %v1749_v10   ;;  %v1128_v14 = vmax.f32 %v881_v13, %v1046_v9 }
 0x18b   :  { %v1181_v22 = vadd.f32 %v1972_v50, %v1128_v14 }
 0x18d   :  { %v1230_v25 = vmax.f32 %v1181_v22, 0.0 }
 0x18e   :  { %v801_v16 = vpop.f32.mrf.mxu2  ;;  %v359_v20 = vpop.f32.mrf.mxu0 }
 0x18f   :  { %v1048_v17 = vpop.f32.mrf.mxu3  ;;  %v882_v19 = vmax.f32 %v635_v15, %v801_v16  ;;  %v557_v21 = vpop.f32.mrf.mxu1 }
 0x190   :  { %v636_v27 = vmax.f32 %v359_v20, %v557_v21 }
 0x191   :  { %v1129_v23 = vmax.f32 %v882_v19, %v1048_v17  ;;  %398 = vmatmul.bf16.gmra.mxu0 %v1648_v18 }
 0x192   :  { %596 = vmatmul.bf16.gmra.mxu1 %v1648_v18 }
 0x193   :  { %v1182_v24 = vadd.f32 %v1972_v50, %v1129_v23  ;;  %843 = vmatmul.bf16.gmra.mxu2 %v1648_v18 }
 0x194   :  { %1090 = vmatmul.bf16.gmra.mxu3 %v1648_v18 }
 0x195   :  { %v1231_v26 = vmax.f32 %v1182_v24, 0.0 }
 0x196   :  { %v804_v28 = vpop.f32.mrf.mxu2  ;;  %v361_v31 = vpop.f32.mrf.mxu0 }
 0x197   :  { %v1051_v29 = vpop.f32.mrf.mxu3  ;;  %v1754_v30 = vpack.c.bf16 %v1231_v26, %v1230_v25  ;;  %v559_v32 = vpop.f32.mrf.mxu1  ;;  %v883_v34 = vmax.f32 %v636_v27, %v804_v28 }
 0x198   :  { %v637_v37 = vmax.f32 %v361_v31, %v559_v32 }
 0x199   :  { %1814 = vst [vmem:[%s2146_s3 + $0x70] sm:$0xff] %v1754_v30   ;;  %v1130_v36 = vmax.f32 %v883_v34, %v1051_v29 }
 0x19b   :  { %v1183_v44 = vadd.f32 %v1972_v50, %v1130_v36 }
 0x19d   :  { %v1232_v47 = vmax.f32 %v1183_v44, 0.0 }
 0x19e   :  { %v806_v38 = vpop.f32.mrf.mxu2  ;;  %v364_v42 = vpop.f32.mrf.mxu0 }
 0x19f   :  { %v1053_v39 = vpop.f32.mrf.mxu3  ;;  %v884_v41 = vmax.f32 %v637_v37, %v806_v38  ;;  %v562_v43 = vpop.f32.mrf.mxu1 }
 0x1a0   :  { %v638_v49 = vmax.f32 %v364_v42, %v562_v43 }
 0x1a1   :  { %v1131_v45 = vmax.f32 %v884_v41, %v1053_v39  ;;  %403 = vmatmul.bf16.gmra.mxu0 %v201_v40 }
 0x1a2   :  { %601 = vmatmul.bf16.gmra.mxu1 %v201_v40 }
 0x1a3   :  { %v1184_v46 = vadd.f32 %v1972_v50, %v1131_v45  ;;  %848 = vmatmul.bf16.gmra.mxu2 %v201_v40 }
 0x1a4   :  { %1095 = vmatmul.bf16.gmra.mxu3 %v201_v40 }
 0x1a5   :  { %v1233_v48 = vmax.f32 %v1184_v46, 0.0 }
 0x1a6   :  { %v809_v51 = vpop.f32.mrf.mxu2  ;;  %v366_v54 = vpop.f32.mrf.mxu0 }
 0x1a7   :  { %v1056_v52 = vpop.f32.mrf.mxu3  ;;  %v1759_v53 = vpack.c.bf16 %v1233_v48, %v1232_v47  ;;  %v564_v55 = vpop.f32.mrf.mxu1  ;;  %v885_v56 = vmax.f32 %v638_v49, %v809_v51 }
 0x1a8   :  { %v639_v58 = vmax.f32 %v366_v54, %v564_v55 }
 0x1a9   :  { %1815 = vst [vmem:[%s2146_s3 + $0x78] sm:$0xff] %v1759_v53   ;;  %v1132_v57 = vmax.f32 %v885_v56, %v1056_v52 }
 0x1ab   :  { %v1185_v0 = vadd.f32 %v1972_v50, %v1132_v57 }
 0x1ad   :  { %v1234_v3 = vmax.f32 %v1185_v0, 0.0 }
 0x1ae   :  { %v811_v59 = vpop.f32.mrf.mxu2  ;;  %v369_v62 = vpop.f32.mrf.mxu0 }
 0x1af   :  { %v1058_v60 = vpop.f32.mrf.mxu3  ;;  %v886_v61 = vmax.f32 %v639_v58, %v811_v59  ;;  %v567_v63 = vpop.f32.mrf.mxu1 }
 0x1b0   :  { %v640_v5 = vmax.f32 %v369_v62, %v567_v63 }
 0x1b1   :  { %v1133_v1 = vmax.f32 %v886_v61, %v1058_v60 }
 0x1b3   :  { %v1186_v2 = vadd.f32 %v1972_v50, %v1133_v1 }
 0x1b5   :  { %v1235_v4 = vmax.f32 %v1186_v2, 0.0 }
 0x1b6   :  { %v814_v6 = vpop.f32.mrf.mxu2  ;;  %v371_v9 = vpop.f32.mrf.mxu0 }
 0x1b7   :  { %v1061_v7 = vpop.f32.mrf.mxu3  ;;  %v1764_v8 = vpack.c.bf16 %v1235_v4, %v1234_v3  ;;  %v569_v10 = vpop.f32.mrf.mxu1  ;;  %v887_v11 = vmax.f32 %v640_v5, %v814_v6 }
 0x1b8   :  { %v641_v13 = vmax.f32 %v371_v9, %v569_v10 }
 0x1b9   :  { %1816 = vst [vmem:[%s2146_s3 + $0x80] sm:$0xff] %v1764_v8   ;;  %v1134_v12 = vmax.f32 %v887_v11, %v1061_v7 }
 0x1bb   :  { %v1187_v19 = vadd.f32 %v1972_v50, %v1134_v12 }
 0x1bd   :  { %v1236_v22 = vmax.f32 %v1187_v19, 0.0 }
 0x1be   :  { %v816_v14 = vpop.f32.mrf.mxu2  ;;  %v374_v17 = vpop.f32.mrf.mxu0 }
 0x1bf   :  { %v1063_v15 = vpop.f32.mrf.mxu3  ;;  %v888_v16 = vmax.f32 %v641_v13, %v816_v14  ;;  %v572_v18 = vpop.f32.mrf.mxu1 }
 0x1c0   :  { %v642_v24 = vmax.f32 %v374_v17, %v572_v18 }
 0x1c1   :  { %v1135_v20 = vmax.f32 %v888_v16, %v1063_v15 }
 0x1c3   :  { %v1188_v21 = vadd.f32 %v1972_v50, %v1135_v20 }
 0x1c5   :  { %v1237_v23 = vmax.f32 %v1188_v21, 0.0 }
 0x1c6   :  { %v819_v25 = vpop.f32.mrf.mxu2  ;;  %v376_v28 = vpop.f32.mrf.mxu0 }
 0x1c7   :  { %v1066_v26 = vpop.f32.mrf.mxu3  ;;  %v1769_v27 = vpack.c.bf16 %v1237_v23, %v1236_v22  ;;  %v574_v29 = vpop.f32.mrf.mxu1  ;;  %v889_v30 = vmax.f32 %v642_v24, %v819_v25 }
 0x1c8   :  { %v643_v32 = vmax.f32 %v376_v28, %v574_v29 }
 0x1c9   :  { %1817 = vst [vmem:[%s2146_s3 + $0x88] sm:$0xff] %v1769_v27   ;;  %v1136_v31 = vmax.f32 %v889_v30, %v1066_v26 }
 0x1cb   :  { %v1189_v38 = vadd.f32 %v1972_v50, %v1136_v31 }
 0x1cd   :  { %v1238_v41 = vmax.f32 %v1189_v38, 0.0 }
 0x1ce   :  { %v821_v33 = vpop.f32.mrf.mxu2  ;;  %v379_v36 = vpop.f32.mrf.mxu0 }
 0x1cf   :  { %v1068_v34 = vpop.f32.mrf.mxu3  ;;  %v890_v35 = vmax.f32 %v643_v32, %v821_v33  ;;  %v577_v37 = vpop.f32.mrf.mxu1 }
 0x1d0   :  { %v644_v43 = vmax.f32 %v379_v36, %v577_v37 }
 0x1d1   :  { %v1137_v39 = vmax.f32 %v890_v35, %v1068_v34  ;;  %v1825_v34 = vld [vmem:[%s2145_s2] ss:$0 sm:$0xff] }
 0x1d3   :  { %v1190_v40 = vadd.f32 %v1972_v50, %v1137_v39 }
 0x1d5   :  { %v1239_v42 = vmax.f32 %v1190_v40, 0.0 }
 0x1d6   :  { %v824_v44 = vpop.f32.mrf.mxu2  ;;  %v381_v47 = vpop.f32.mrf.mxu0 }
 0x1d7   :  { %v1071_v45 = vpop.f32.mrf.mxu3  ;;  %v1774_v46 = vpack.c.bf16 %v1239_v42, %v1238_v41  ;;  %v579_v48 = vpop.f32.mrf.mxu1  ;;  %v891_v49 = vmax.f32 %v644_v43, %v824_v44 }
 0x1d8   :  { %v645_v52 = vmax.f32 %v381_v47, %v579_v48 }
 0x1d9   :  { %1818 = vst [vmem:[%s2146_s3 + $0x90] sm:$0xff] %v1774_v46   ;;  %v1138_v51 = vmax.f32 %v891_v49, %v1071_v45 }
 0x1db   :  { %v1191_v58 = vadd.f32 %v1972_v50, %v1138_v51 }
 0x1dd   :  { %v1240_v61 = vmax.f32 %v1191_v58, 0.0 }
 0x1de   :  { %v826_v53 = vpop.f32.mrf.mxu2  ;;  %v384_v56 = vpop.f32.mrf.mxu0 }
 0x1df   :  { %v1073_v54 = vpop.f32.mrf.mxu3  ;;  %v892_v55 = vmax.f32 %v645_v52, %v826_v53  ;;  %v582_v57 = vpop.f32.mrf.mxu1 }
 0x1e0   :  { %v646_v63 = vmax.f32 %v384_v56, %v582_v57 }
 0x1e1   :  { %v1139_v59 = vmax.f32 %v892_v55, %v1073_v54 }
 0x1e3   :  { %v1192_v60 = vadd.f32 %v1972_v50, %v1139_v59 }
 0x1e5   :  { %v1241_v62 = vmax.f32 %v1192_v60, 0.0 }
 0x1e6   :  { %v829_v0 = vpop.f32.mrf.mxu2  ;;  %v386_v3 = vpop.f32.mrf.mxu0 }
 0x1e7   :  { %v1076_v1 = vpop.f32.mrf.mxu3  ;;  %v1779_v2 = vpack.c.bf16 %v1241_v62, %v1240_v61  ;;  %v584_v4 = vpop.f32.mrf.mxu1  ;;  %v893_v5 = vmax.f32 %v646_v63, %v829_v0 }
 0x1e8   :  { %v647_v7 = vmax.f32 %v386_v3, %v584_v4 }
 0x1e9   :  { %1819 = vst [vmem:[%s2146_s3 + $0x98] sm:$0xff] %v1779_v2   ;;  %v1140_v6 = vmax.f32 %v893_v5, %v1076_v1 }
 0x1eb   :  { %v1193_v13 = vadd.f32 %v1972_v50, %v1140_v6 }
 0x1ed   :  { %v1242_v16 = vmax.f32 %v1193_v13, 0.0 }
 0x1ee   :  { %v831_v8 = vpop.f32.mrf.mxu2  ;;  %v389_v11 = vpop.f32.mrf.mxu0 }
 0x1ef   :  { %v1078_v9 = vpop.f32.mrf.mxu3  ;;  %v894_v10 = vmax.f32 %v647_v7, %v831_v8  ;;  %v587_v12 = vpop.f32.mrf.mxu1 }
 0x1f0   :  { %v648_v18 = vmax.f32 %v389_v11, %v587_v12 }
 0x1f1   :  { %v1141_v14 = vmax.f32 %v894_v10, %v1078_v9 }
 0x1f3   :  { %v1194_v15 = vadd.f32 %v1972_v50, %v1141_v14 }
 0x1f5   :  { %v1243_v17 = vmax.f32 %v1194_v15, 0.0 }
 0x1f6   :  { %v834_v19 = vpop.f32.mrf.mxu2  ;;  %v391_v22 = vpop.f32.mrf.mxu0 }
 0x1f7   :  { %v1081_v20 = vpop.f32.mrf.mxu3  ;;  %v1784_v21 = vpack.c.bf16 %v1243_v17, %v1242_v16  ;;  %v589_v23 = vpop.f32.mrf.mxu1  ;;  %v895_v24 = vmax.f32 %v648_v18, %v834_v19 }
 0x1f8   :  { %v649_v26 = vmax.f32 %v391_v22, %v589_v23 }
 0x1f9   :  { %1820 = vst [vmem:[%s2146_s3 + $0xa0] sm:$0xff] %v1784_v21   ;;  %v1142_v25 = vmax.f32 %v895_v24, %v1081_v20 }
 0x1fb   :  { %v1195_v32 = vadd.f32 %v1972_v50, %v1142_v25 }
 0x1fd   :  { %v1244_v36 = vmax.f32 %v1195_v32, 0.0 }
 0x1fe   :  { %v836_v27 = vpop.f32.mrf.mxu2  ;;  %v394_v30 = vpop.f32.mrf.mxu0 }
 0x1ff   :  { %v1083_v28 = vpop.f32.mrf.mxu3  ;;  %v896_v29 = vmax.f32 %v649_v26, %v836_v27  ;;  %v592_v31 = vpop.f32.mrf.mxu1 }
 0x200   :  { %v650_v38 = vmax.f32 %v394_v30, %v592_v31 }
 0x201   :  { %v1143_v33 = vmax.f32 %v896_v29, %v1083_v28 }
 0x203   :  { %v1196_v35 = vadd.f32 %v1825_v34, %v1143_v33 }
 0x205   :  { %v1245_v37 = vmax.f32 %v1196_v35, 0.0 }
 0x206   :  { %v839_v39 = vpop.f32.mrf.mxu2  ;;  %v396_v42 = vpop.f32.mrf.mxu0 }
 0x207   :  { %v1086_v40 = vpop.f32.mrf.mxu3  ;;  %v1789_v41 = vpack.c.bf16 %v1245_v37, %v1244_v36  ;;  %v594_v43 = vpop.f32.mrf.mxu1  ;;  %v897_v44 = vmax.f32 %v650_v38, %v839_v39 }
 0x208   :  { %v651_v45 = vmax.f32 %v396_v42, %v594_v43 }
 0x209   :  { %1821 = vst [vmem:[%s2146_s3 + $0xa8] sm:$0xff] %v1789_v41   ;;  %v1144_v50 = vmax.f32 %v897_v44, %v1086_v40 }
 0x20b   :  { %v1197_v52 = vadd.f32 %v1825_v34, %v1144_v50 }
 0x20d   :  { %v1246_v55 = vmax.f32 %v1197_v52, 0.0 }
 0x20e   :  { %v841_v46 = vpop.f32.mrf.mxu2  ;;  %v399_v49 = vpop.f32.mrf.mxu0 }
 0x20f   :  { %v1088_v47 = vpop.f32.mrf.mxu3  ;;  %v898_v48 = vmax.f32 %v651_v45, %v841_v46  ;;  %v597_v51 = vpop.f32.mrf.mxu1 }
 0x210   :  { %v652_v57 = vmax.f32 %v399_v49, %v597_v51 }
 0x211   :  { %v1145_v53 = vmax.f32 %v898_v48, %v1088_v47 }
 0x213   :  { %v1198_v54 = vadd.f32 %v1825_v34, %v1145_v53 }
 0x215   :  { %v1247_v56 = vmax.f32 %v1198_v54, 0.0 }
 0x216   :  { %v844_v58 = vpop.f32.mrf.mxu2  ;;  %v401_v61 = vpop.f32.mrf.mxu0 }
 0x217   :  { %v1091_v59 = vpop.f32.mrf.mxu3  ;;  %v1794_v60 = vpack.c.bf16 %v1247_v56, %v1246_v55  ;;  %v599_v62 = vpop.f32.mrf.mxu1  ;;  %v899_v63 = vmax.f32 %v652_v57, %v844_v58 }
 0x218   :  { %v653_v1 = vmax.f32 %v401_v61, %v599_v62 }
 0x219   :  { %1822 = vst [vmem:[%s2146_s3 + $0xb0] sm:$0xff] %v1794_v60   ;;  %v1146_v0 = vmax.f32 %v899_v63, %v1091_v59 }
 0x21b   :  { %v1199_v7 = vadd.f32 %v1825_v34, %v1146_v0 }
 0x21d   :  { %v1248_v11 = vmax.f32 %v1199_v7, 0.0 }
 0x21e   :  { %v846_v2 = vpop.f32.mrf.mxu2  ;;  %v404_v5 = vpop.f32.mrf.mxu0 }
 0x21f   :  { %v1093_v3 = vpop.f32.mrf.mxu3  ;;  %v900_v4 = vmax.f32 %v653_v1, %v846_v2  ;;  %v602_v6 = vpop.f32.mrf.mxu1 }
 0x220   :  { %v654_v10 = vmax.f32 %v404_v5, %v602_v6 }
 0x221   :  { %v1147_v8 = vmax.f32 %v900_v4, %v1093_v3 }
 0x223   :  { %v1200_v9 = vadd.f32 %v1825_v34, %v1147_v8 }
 0x225   :  { %v1249_v12 = vmax.f32 %v1200_v9, 0.0 }
 0x226   :  { %v849_v13 = vpop.f32.mrf.mxu2  ;;  %v406_v17 = vpop.f32.mrf.mxu0 }
 0x227   :  { %v1096_v14 = vpop.f32.mrf.mxu3  ;;  %v1799_v15 = vpack.c.bf16 %v1249_v12, %v1248_v11  ;;  %v901_v16 = vmax.f32 %v654_v10, %v849_v13  ;;  %v604_v18 = vpop.f32.mrf.mxu1 }
 0x229   :  { %1823 = vst [vmem:[%s2146_s3 + $0xb8] sm:$0xff] %v1799_v15   ;;  %v1148_v19 = vmax.f32 %v901_v16, %v1096_v14 }
 0x22b   :  { %v1201_v20 = vadd.f32 %v1825_v34, %v1148_v19 }
 0x22d   :  { %v1250_v21 = vmax.f32 %v1201_v20, 0.0 }
 0x22e   :  { %v851_v22 = vpop.f32.mrf.mxu2 }
 0x22f   :  { %v1098_v23 = vpop.f32.mrf.mxu3  ;;  %v1299_v24 = vpack.c.bf16 %v1250_v21, %v1250_v21 }
 0x231   :  { %1348 = vst [vmem:[%s2146_s3 + $0xc0] sm:$0xf] %v1299_v24 }

// kernel: lenet_forward.4
= control target key start
LH: loop header
LB: loop body
LE: loop exit
PB: predicated region body
PF: predicated region fallthrough
CT: control target
= control target key end

     0   :  { %s1653_s1 = inlined_call_operand.vmem [shape: bf16[4,256,128], index: 1, kind: input, shape index: {}]   ;;  %s1654_s0 = inlined_call_operand.vmem [shape: bf16[50,256], index: 0, kind: input, shape index: {}]   ;;  %s1655_s2 = inlined_call_operand.vmem [shape: f32[1,128], index: 2, kind: input, shape index: {}]   ;;  %s1656_s3 = inlined_call_operand.vmem [shape: bf16[50,128], index: 3, kind: output, shape index: {}]  }
   0x1   :  { %v1243_v0 = vld [vmem:[%s1653_s1 + $0x38] sm:$0xff]  ;;  %v1242_v4 = vld [vmem:[%s1653_s1 + $0x30] sm:$0xff]  ;;  %v1241_v8 = vld [vmem:[%s1653_s1 + $0x28] sm:$0xff] }
   0x2   :  { %v1251_v1 = vld [vmem:[%s1653_s1 + $0x78] sm:$0xff]  ;;  %186 = vmatpush.bf16.msra.mxu0 %v1243_v0  ;;  %v1250_v5 = vld [vmem:[%s1653_s1 + $0x70] sm:$0xff]  ;;  %v1249_v9 = vld [vmem:[%s1653_s1 + $0x68] sm:$0xff] }
   0x3   :  { %v1259_v2 = vld [vmem:[%s1653_s1 + $0xb8] sm:$0xff]  ;;  %214 = vmatpush.bf16.msra.mxu1 %v1251_v1  ;;  %v1258_v6 = vld [vmem:[%s1653_s1 + $0xb0] sm:$0xff]  ;;  %v1257_v10 = vld [vmem:[%s1653_s1 + $0xa8] sm:$0xff] }
   0x4   :  { %v1267_v3 = vld [vmem:[%s1653_s1 + $0xf8] sm:$0xff]  ;;  %371 = vmatpush.bf16.msra.mxu2 %v1259_v2  ;;  %v1266_v7 = vld [vmem:[%s1653_s1 + $0xf0] sm:$0xff]  ;;  %v1265_v11 = vld [vmem:[%s1653_s1 + $0xe8] sm:$0xff] }
   0x5   :  { %399 = vmatpush.bf16.msra.mxu3 %v1267_v3  ;;  %v1240_v12 = vld [vmem:[%s1653_s1 + $0x20] sm:$0xff]  ;;  %v1239_v16 = vld [vmem:[%s1653_s1 + $0x18] sm:$0xff]  ;;  %v1238_v20 = vld [vmem:[%s1653_s1 + $0x10] sm:$0xff] }
   0x6   :  { %187 = vmatpush.bf16.msra.mxu0 %v1242_v4  ;;  %v1248_v13 = vld [vmem:[%s1653_s1 + $0x60] sm:$0xff]  ;;  %v1247_v17 = vld [vmem:[%s1653_s1 + $0x58] sm:$0xff]  ;;  %v1246_v21 = vld [vmem:[%s1653_s1 + $0x50] sm:$0xff] }
   0x7   :  { %215 = vmatpush.bf16.msra.mxu1 %v1250_v5  ;;  %v1256_v14 = vld [vmem:[%s1653_s1 + $0xa0] sm:$0xff]  ;;  %v1255_v18 = vld [vmem:[%s1653_s1 + $0x98] sm:$0xff]  ;;  %v1254_v22 = vld [vmem:[%s1653_s1 + $0x90] sm:$0xff] }
   0x8   :  { %372 = vmatpush.bf16.msra.mxu2 %v1258_v6  ;;  %v1264_v15 = vld [vmem:[%s1653_s1 + $0xe0] sm:$0xff]  ;;  %v1263_v19 = vld [vmem:[%s1653_s1 + $0xd8] sm:$0xff]  ;;  %v1262_v23 = vld [vmem:[%s1653_s1 + $0xd0] sm:$0xff] }
   0x9   :  { %400 = vmatpush.bf16.msra.mxu3 %v1266_v7  ;;  %v1237_v24 = vld [vmem:[%s1653_s1 + $0x8] sm:$0xff]  ;;  %v1236_v28 = vld [vmem:[%s1653_s1] sm:$0xff]  ;;  %v1291_v36 = vld [vmem:[%s1653_s1 + $0x1b8] sm:$0xff] }
   0xa   :  { %188 = vmatpush.bf16.msra.mxu0 %v1241_v8  ;;  %v1245_v25 = vld [vmem:[%s1653_s1 + $0x48] sm:$0xff]  ;;  %v1244_v29 = vld [vmem:[%s1653_s1 + $0x40] sm:$0xff]  ;;  %v1299_v37 = vld [vmem:[%s1653_s1 + $0x1f8] sm:$0xff] }
   0xb   :  { %216 = vmatpush.bf16.msra.mxu1 %v1249_v9  ;;  %v1253_v26 = vld [vmem:[%s1653_s1 + $0x88] sm:$0xff]  ;;  %v856_v30 = vld [vmem:[%s1654_s0] sm:$0xf]  ;;  %v1230_v32 = vld [vmem:[%s1654_s0 + $0x4] sm:$0xf] }
   0xc   :  { %373 = vmatpush.bf16.msra.mxu2 %v1257_v10  ;;  %v1261_v27 = vld [vmem:[%s1653_s1 + $0xc8] sm:$0xff]  ;;  %v1252_v34 = vld [vmem:[%s1653_s1 + $0x80] sm:$0xff]  ;;  %v1275_v40 = vld [vmem:[%s1653_s1 + $0x138] sm:$0xff] }
   0xd   :  { %401 = vmatpush.bf16.msra.mxu3 %v1265_v11  ;;  %v1231_v31 = vld [vmem:[%s1654_s0 + $0x4] sm:$0xf0]  ;;  %v858_v33 = vld [vmem:[%s1654_s0 + $0x8] sm:$0xf0]  ;;  %v1260_v35 = vld [vmem:[%s1653_s1 + $0xc0] sm:$0xff] }
   0xe   :  { %189 = vmatpush.bf16.msra.mxu0 %v1240_v12  ;;  %v1452_v38 = vor.u32 %v1231_v31, %v856_v30  ;;  %v1454_v39 = vor.u32 %v1230_v32, %v858_v33  ;;  %v1283_v41 = vld [vmem:[%s1653_s1 + $0x178] sm:$0xff]  ;;  %v1290_v42 = vld [vmem:[%s1653_s1 + $0x1b0] sm:$0xff]  ;;  %v1289_v46 = vld [vmem:[%s1653_s1 + $0x1a8] sm:$0xff] }
   0xf   :  { %217 = vmatpush.bf16.msra.mxu1 %v1248_v13  ;;  %v1298_v43 = vld [vmem:[%s1653_s1 + $0x1f0] sm:$0xff]  ;;  %v1297_v47 = vld [vmem:[%s1653_s1 + $0x1e8] sm:$0xff]  ;;  %v1288_v50 = vld [vmem:[%s1653_s1 + $0x1a0] sm:$0xff] }
  0x10   :  { %374 = vmatpush.bf16.msra.mxu2 %v1256_v14  ;;  %v1274_v44 = vld [vmem:[%s1653_s1 + $0x130] sm:$0xff]  ;;  %v1273_v48 = vld [vmem:[%s1653_s1 + $0x128] sm:$0xff]  ;;  %v1296_v51 = vld [vmem:[%s1653_s1 + $0x1e0] sm:$0xff] }
  0x11   :  { %402 = vmatpush.bf16.msra.mxu3 %v1264_v15  ;;  %v1282_v45 = vld [vmem:[%s1653_s1 + $0x170] sm:$0xff]  ;;  %v1281_v49 = vld [vmem:[%s1653_s1 + $0x168] sm:$0xff]  ;;  %v1233_v53 = vld [vmem:[%s1654_s0 + $0x14] sm:$0xf0] }
  0x12   :  { %190 = vmatpush.bf16.msra.mxu0 %v1239_v16  ;;  %v864_v52 = vld [vmem:[%s1654_s0 + $0x10] sm:$0xf]  ;;  %v1232_v54 = vld [vmem:[%s1654_s0 + $0x14] sm:$0xf]  ;;  %v866_v55 = vld [vmem:[%s1654_s0 + $0x18] sm:$0xf0] }
  0x13   :  { %218 = vmatpush.bf16.msra.mxu1 %v1247_v17  ;;  %v1272_v56 = vld [vmem:[%s1653_s1 + $0x120] sm:$0xff]  ;;  %v1287_v58 = vld [vmem:[%s1653_s1 + $0x198] sm:$0xff]  ;;  %v1520_v60 = vor.u32 %v1233_v53, %v864_v52  ;;  %v1522_v61 = vor.u32 %v1232_v54, %v866_v55  ;;  %v1286_v0 = vld [vmem:[%s1653_s1 + $0x190] sm:$0xff] }
  0x14   :  { %375 = vmatpush.bf16.msra.mxu2 %v1255_v18  ;;  %v1280_v57 = vld [vmem:[%s1653_s1 + $0x160] sm:$0xff]  ;;  %v1295_v59 = vld [vmem:[%s1653_s1 + $0x1d8] sm:$0xff]  ;;  %v1294_v1 = vld [vmem:[%s1653_s1 + $0x1d0] sm:$0xff] }
  0x15   :  { %403 = vmatpush.bf16.msra.mxu3 %v1263_v19  ;;  %v1271_v62 = vld [vmem:[%s1653_s1 + $0x118] sm:$0xff]  ;;  %v1270_v2 = vld [vmem:[%s1653_s1 + $0x110] sm:$0xff]  ;;  %v1285_v4 = vld [vmem:[%s1653_s1 + $0x188] sm:$0xff] }
  0x16   :  { %191 = vmatpush.bf16.msra.mxu0 %v1238_v20  ;;  %v1279_v63 = vld [vmem:[%s1653_s1 + $0x158] sm:$0xff]  ;;  %v1278_v3 = vld [vmem:[%s1653_s1 + $0x150] sm:$0xff]  ;;  %v1293_v5 = vld [vmem:[%s1653_s1 + $0x1c8] sm:$0xff] }
  0x17   :  { %219 = vmatpush.bf16.msra.mxu1 %v1246_v21  ;;  %v1269_v6 = vld [vmem:[%s1653_s1 + $0x108] sm:$0xff]  ;;  %v1284_v8 = vld [vmem:[%s1653_s1 + $0x180] sm:$0xff]  ;;  %v20_v18 = vld [vmem:[%s1654_s0 + $0x30] sm:$0x11] }
  0x18   :  { %376 = vmatpush.bf16.msra.mxu2 %v1254_v22  ;;  %v1277_v7 = vld [vmem:[%s1653_s1 + $0x148] sm:$0xff]  ;;  %v1292_v9 = vld [vmem:[%s1653_s1 + $0x1c0] sm:$0xff]  ;;  %v72_v19 = vunpack.c.l.b16 %v20_v18  ;;  %v73_v20 = vunpack.c.h.b16 %v20_v18 }
  0x19   :  { %404 = vmatpush.bf16.msra.mxu3 %v1262_v23  ;;  %v872_v10 = vld [vmem:[%s1654_s0 + $0x20] sm:$0xf]  ;;  %v1235_v11 = vld [vmem:[%s1654_s0 + $0x24] sm:$0xf0]  ;;  %v1234_v12 = vld [vmem:[%s1654_s0 + $0x24] sm:$0xf] }
  0x1a   :  { %192 = vmatpush.bf16.msra.mxu0 %v1237_v24  ;;  %v874_v13 = vld [vmem:[%s1654_s0 + $0x28] sm:$0xf0]  ;;  %v1268_v14 = vld [vmem:[%s1653_s1 + $0x100] sm:$0xff]  ;;  %v873_v16 = vor.u32 %v1235_v11, %v872_v10  ;;  %v80_v21 = vpack.c.b16 %v72_v19, %v72_v19  ;;  %v81_v22 = vpack.c.b16 %v73_v20, %v73_v20 }
  0x1b   :  { %220 = vmatpush.bf16.msra.mxu1 %v1245_v25  ;;  %v1276_v15 = vld [vmem:[%s1653_s1 + $0x140] sm:$0xff]  ;;  %v877_v17 = vor.u32 %v1234_v12, %v874_v13 }
  0x1c   :  { %377 = vmatpush.bf16.msra.mxu2 %v1253_v26 }
  0x1d   :  { %405 = vmatpush.bf16.msra.mxu3 %v1261_v27 }
  0x1e   :  { %193 = vmatpush.bf16.msra.mxu0 %v1236_v28 }
  0x1f   :  { %221 = vmatpush.bf16.msra.mxu1 %v1244_v29 }
  0x20   :  { %378 = vmatpush.bf16.msra.mxu2 %v1252_v34 }
  0x21   :  { %406 = vmatpush.bf16.msra.mxu3 %v1260_v35  ;;  %194 = vmatmul.bf16.vlgmr.msra.gmra.mxu0 %v1452_v38 }
  0x22   :  { %222 = vmatmul.bf16.vlgmr.msra.gmra.mxu1 %v1454_v39  ;;  %563 = vmatpush.bf16.msrb.mxu0 %v1275_v40 }
  0x23   :  { %379 = vmatmul.bf16.vlgmr.msra.gmra.mxu2 %v1452_v38  ;;  %591 = vmatpush.bf16.msrb.mxu1 %v1283_v41 }
  0x24   :  { %755 = vmatpush.bf16.msrb.mxu2 %v1291_v36  ;;  %407 = vmatmul.bf16.vlgmr.msra.gmra.mxu3 %v1454_v39 }
  0x25   :  { %783 = vmatpush.bf16.msrb.mxu3 %v1299_v37 }
  0x26   :  { %564 = vmatpush.bf16.msrb.mxu0 %v1274_v44 }
  0x27   :  { %592 = vmatpush.bf16.msrb.mxu1 %v1282_v45 }
  0x28   :  { %756 = vmatpush.bf16.msrb.mxu2 %v1290_v42 }
  0x29   :  { %784 = vmatpush.bf16.msrb.mxu3 %v1298_v43 }
  0x2a   :  { %565 = vmatpush.bf16.msrb.mxu0 %v1273_v48 }
  0x2b   :  { %593 = vmatpush.bf16.msrb.mxu1 %v1281_v49 }
  0x2c   :  { %757 = vmatpush.bf16.msrb.mxu2 %v1289_v46 }
  0x2d   :  { %785 = vmatpush.bf16.msrb.mxu3 %v1297_v47 }
  0x2e   :  { %566 = vmatpush.bf16.msrb.mxu0 %v1272_v56 }
  0x2f   :  { %594 = vmatpush.bf16.msrb.mxu1 %v1280_v57 }
  0x30   :  { %758 = vmatpush.bf16.msrb.mxu2 %v1288_v50 }
  0x31   :  { %786 = vmatpush.bf16.msrb.mxu3 %v1296_v51  ;;  %199 = vmatmul.bf16.gmra.mxu0 %v1520_v60 }
  0x32   :  { %227 = vmatmul.bf16.gmra.mxu1 %v1522_v61  ;;  %567 = vmatpush.bf16.msrb.mxu0 %v1271_v62 }
  0x33   :  { %384 = vmatmul.bf16.gmra.mxu2 %v1520_v60  ;;  %595 = vmatpush.bf16.msrb.mxu1 %v1279_v63 }
  0x34   :  { %759 = vmatpush.bf16.msrb.mxu2 %v1287_v58  ;;  %412 = vmatmul.bf16.gmra.mxu3 %v1522_v61 }
  0x35   :  { %787 = vmatpush.bf16.msrb.mxu3 %v1295_v59 }
  0x36   :  { %568 = vmatpush.bf16.msrb.mxu0 %v1270_v2 }
  0x37   :  { %596 = vmatpush.bf16.msrb.mxu1 %v1278_v3 }
  0x38   :  { %760 = vmatpush.bf16.msrb.mxu2 %v1286_v0 }
  0x39   :  { %788 = vmatpush.bf16.msrb.mxu3 %v1294_v1 }
  0x3a   :  { %569 = vmatpush.bf16.msrb.mxu0 %v1269_v6 }
  0x3b   :  { %597 = vmatpush.bf16.msrb.mxu1 %v1277_v7 }
  0x3c   :  { %761 = vmatpush.bf16.msrb.mxu2 %v1285_v4 }
  0x3d   :  { %789 = vmatpush.bf16.msrb.mxu3 %v1293_v5 }
  0x3e   :  { %570 = vmatpush.bf16.msrb.mxu0 %v1268_v14 }
  0x3f   :  { %598 = vmatpush.bf16.msrb.mxu1 %v1276_v15 }
  0x40   :  { %762 = vmatpush.bf16.msrb.mxu2 %v1284_v8 }
  0x41   :  { %790 = vmatpush.bf16.msrb.mxu3 %v1292_v9  ;;  %204 = vmatmul.bf16.gmra.mxu0 %v873_v16 }
  0x42   :  { %232 = vmatmul.bf16.gmra.mxu1 %v877_v17 }
  0x43   :  { %389 = vmatmul.bf16.gmra.mxu2 %v873_v16 }
  0x44   :  { %417 = vmatmul.bf16.gmra.mxu3 %v877_v17 }
  0x51   :  { %209 = vmatmul.bf16.gmra.mxu0 %v80_v21 }
  0x52   :  { %237 = vmatmul.bf16.gmra.mxu1 %v81_v22 }
  0x53   :  { %394 = vmatmul.bf16.gmra.mxu2 %v80_v21 }
  0x54   :  { %422 = vmatmul.bf16.gmra.mxu3 %v81_v22 }
  0x61   :  { %571 = vmatmul.bf16.vlgmr.msrb.gmra.mxu0 %v1452_v38 }
  0x62   :  { %599 = vmatmul.bf16.vlgmr.msrb.gmra.mxu1 %v1454_v39 }
  0x63   :  { %763 = vmatmul.bf16.vlgmr.msrb.gmra.mxu2 %v1452_v38 }
  0x64   :  { %791 = vmatmul.bf16.vlgmr.msrb.gmra.mxu3 %v1454_v39 }
  0x71   :  { %576 = vmatmul.bf16.gmra.mxu0 %v1520_v60 }
  0x72   :  { %604 = vmatmul.bf16.gmra.mxu1 %v1522_v61 }
  0x73   :  { %768 = vmatmul.bf16.gmra.mxu2 %v1520_v60 }
  0x74   :  { %796 = vmatmul.bf16.gmra.mxu3 %v1522_v61 }
  0x81   :  { %581 = vmatmul.bf16.gmra.mxu0 %v873_v16 }
  0x82   :  { %609 = vmatmul.bf16.gmra.mxu1 %v877_v17 }
  0x83   :  { %773 = vmatmul.bf16.gmra.mxu2 %v873_v16 }
  0x84   :  { %801 = vmatmul.bf16.gmra.mxu3 %v877_v17  ;;  %v1622_v17 = vld [vmem:[%s1655_s2] ss:$0 sm:$0xff] }
  0x91   :  { %586 = vmatmul.bf16.gmra.mxu0 %v80_v21 }
  0x92   :  { %614 = vmatmul.bf16.gmra.mxu1 %v81_v22 }
  0x93   :  { %778 = vmatmul.bf16.gmra.mxu2 %v80_v21 }
  0x94   :  { %806 = vmatmul.bf16.gmra.mxu3 %v81_v22 }
  0x9e   :  { %v195_v23 = vpop.f32.mrf.mxu0 }
  0x9f   :  { %v223_v24 = vpop.f32.mrf.mxu1 }
  0xa0   :  { %v224_v25 = vadd.f32 %v223_v24, %v195_v23 }
  0xa6   :  { %v380_v26 = vpop.f32.mrf.mxu2  ;;  %v197_v29 = vpop.f32.mrf.mxu0 }
  0xa7   :  { %v408_v27 = vpop.f32.mrf.mxu3  ;;  %v225_v30 = vpop.f32.mrf.mxu1 }
  0xa8   :  { %v409_v28 = vadd.f32 %v408_v27, %v380_v26  ;;  %v226_v31 = vadd.f32 %v225_v30, %v197_v29 }
  0xaa   :  { %v427_v32 = vmax.f32 %v224_v25, %v409_v28 }
  0xae   :  { %v382_v33 = vpop.f32.mrf.mxu2  ;;  %v200_v35 = vpop.f32.mrf.mxu0 }
  0xaf   :  { %v410_v34 = vpop.f32.mrf.mxu3  ;;  %v228_v36 = vpop.f32.mrf.mxu1 }
  0xb0   :  { %v1593_v37 = vadd.f32 %v228_v36, %v200_v35  ;;  %v411_v11 = vadd.f32 %v410_v34, %v382_v33 }
  0xb2   :  { %v428_v15 = vmax.f32 %v226_v31, %v411_v11 }
  0xb6   :  { %v385_v38 = vpop.f32.mrf.mxu2  ;;  %v202_v41 = vpop.f32.mrf.mxu0 }
  0xb7   :  { %v413_v39 = vpop.f32.mrf.mxu3  ;;  %v230_v42 = vpop.f32.mrf.mxu1 }
  0xb8   :  { %v1595_v40 = vadd.f32 %v413_v39, %v385_v38  ;;  %v1597_v43 = vadd.f32 %v230_v42, %v202_v41 }
  0xba   :  { %v429_v44 = vmax.f32 %v1593_v37, %v1595_v40 }
  0xbe   :  { %v387_v45 = vpop.f32.mrf.mxu2  ;;  %v205_v47 = vpop.f32.mrf.mxu0 }
  0xbf   :  { %v415_v46 = vpop.f32.mrf.mxu3  ;;  %v233_v48 = vpop.f32.mrf.mxu1 }
  0xc0   :  { %v1601_v49 = vadd.f32 %v233_v48, %v205_v47  ;;  %v416_v35 = vadd.f32 %v415_v46, %v387_v45 }
  0xc2   :  { %v430_v39 = vmax.f32 %v1597_v43, %v416_v35 }
  0xc6   :  { %v390_v50 = vpop.f32.mrf.mxu2  ;;  %v207_v53 = vpop.f32.mrf.mxu0 }
  0xc7   :  { %v418_v51 = vpop.f32.mrf.mxu3  ;;  %v235_v54 = vpop.f32.mrf.mxu1 }
  0xc8   :  { %v1603_v52 = vadd.f32 %v418_v51, %v390_v50  ;;  %v1605_v55 = vadd.f32 %v235_v54, %v207_v53 }
  0xca   :  { %v431_v56 = vmax.f32 %v1601_v49, %v1603_v52 }
  0xce   :  { %v1609_v57 = vpop.f32.mrf.mxu2  ;;  %v210_v59 = vpop.f32.mrf.mxu0 }
  0xcf   :  { %v1611_v58 = vpop.f32.mrf.mxu3  ;;  %v238_v60 = vpop.f32.mrf.mxu1 }
  0xd0   :  { %v1613_v61 = vadd.f32 %v238_v60, %v210_v59 }
  0xd6   :  { %v1615_v62 = vpop.f32.mrf.mxu2  ;;  %v212_v0 = vpop.f32.mrf.mxu0 }
  0xd7   :  { %v1617_v63 = vpop.f32.mrf.mxu3  ;;  %v240_v1 = vpop.f32.mrf.mxu1 }
  0xde   :  { %v397_v2 = vpop.f32.mrf.mxu2  ;;  %v572_v4 = vpop.f32.mrf.mxu0 }
  0xdf   :  { %v425_v3 = vpop.f32.mrf.mxu3  ;;  %v600_v5 = vpop.f32.mrf.mxu1 }
  0xe0   :  { %v601_v8 = vadd.f32 %v600_v5, %v572_v4  ;;  %v421_v3 = vadd.f32 %v1611_v58, %v1609_v57  ;;  %v424_v57 = vadd.f32 %v1617_v63, %v1615_v62 }
  0xe2   :  { %v619_v13 = vmax.f32 %v427_v32, %v601_v8  ;;  %v433_v52 = vmax.f32 %v1613_v61, %v424_v57 }
  0xe6   :  { %v764_v6 = vpop.f32.mrf.mxu2  ;;  %v574_v9 = vpop.f32.mrf.mxu0 }
  0xe7   :  { %v792_v7 = vpop.f32.mrf.mxu3  ;;  %v602_v10 = vpop.f32.mrf.mxu1 }
  0xe8   :  { %v793_v12 = vadd.f32 %v792_v7, %v764_v6  ;;  %v603_v14 = vadd.f32 %v602_v10, %v574_v9  ;;  %v432_v7 = vmax.f32 %v1605_v55, %v421_v3 }
  0xea   :  { %v811_v16 = vmax.f32 %v619_v13, %v793_v12  ;;  %v620_v20 = vmax.f32 %v428_v15, %v603_v14 }
  0xec   :  { %v822_v24 = vadd.f32 %v1622_v17, %v811_v16 }
  0xee   :  { %v766_v18 = vpop.f32.mrf.mxu2  ;;  %v577_v22 = vpop.f32.mrf.mxu0  ;;  %v829_v27 = vmax.f32 %v822_v24, 0.0 }
  0xef   :  { %v794_v19 = vpop.f32.mrf.mxu3  ;;  %v605_v23 = vpop.f32.mrf.mxu1 }
  0xf0   :  { %v795_v21 = vadd.f32 %v794_v19, %v766_v18  ;;  %v606_v32 = vadd.f32 %v605_v23, %v577_v22 }
  0xf2   :  { %v812_v25 = vmax.f32 %v620_v20, %v795_v21  ;;  %v621_v37 = vmax.f32 %v429_v44, %v606_v32 }
  0xf4   :  { %v823_v26 = vadd.f32 %v1622_v17, %v812_v25 }
  0xf6   :  { %v830_v28 = vmax.f32 %v823_v26, 0.0  ;;  %v769_v29 = vpop.f32.mrf.mxu2  ;;  %v579_v33 = vpop.f32.mrf.mxu0 }
  0xf7   :  { %v797_v30 = vpop.f32.mrf.mxu3  ;;  %v607_v34 = vpop.f32.mrf.mxu1 }
  0xf8   :  { %v1303_v31 = vpack.c.bf16 %v830_v28, %v829_v27  ;;  %v798_v36 = vadd.f32 %v797_v30, %v769_v29  ;;  %v608_v38 = vadd.f32 %v607_v34, %v579_v33 }
  0xfa   :  { %1304 = vst [vmem:[%s1656_s3] sm:$0xff] %v1303_v31   ;;  %v813_v40 = vmax.f32 %v621_v37, %v798_v36  ;;  %v622_v47 = vmax.f32 %v430_v39, %v608_v38 }
  0xfc   :  { %v824_v53 = vadd.f32 %v1622_v17, %v813_v40 }
  0xfe   :  { %v771_v41 = vpop.f32.mrf.mxu2  ;;  %v582_v50 = vpop.f32.mrf.mxu0  ;;  %v831_v46 = vmax.f32 %v824_v53, 0.0 }
  0xff   :  { %v799_v42 = vpop.f32.mrf.mxu3  ;;  %v610_v51 = vpop.f32.mrf.mxu1 }
 0x100   :  { %v800_v48 = vadd.f32 %v799_v42, %v771_v41  ;;  %v611_v1 = vadd.f32 %v610_v51, %v582_v50 }
 0x102   :  { %v814_v54 = vmax.f32 %v622_v47, %v800_v48  ;;  %v623_v5 = vmax.f32 %v431_v56, %v611_v1 }
 0x104   :  { %v825_v45 = vadd.f32 %v1622_v17, %v814_v54 }
 0x106   :  { %v832_v59 = vmax.f32 %v825_v45, 0.0  ;;  %v774_v60 = vpop.f32.mrf.mxu2  ;;  %v584_v2 = vpop.f32.mrf.mxu0 }
 0x107   :  { %v802_v0 = vpop.f32.mrf.mxu3  ;;  %v612_v43 = vpop.f32.mrf.mxu1 }
 0x108   :  { %v1308_v44 = vpack.c.bf16 %v832_v59, %v831_v46  ;;  %v803_v4 = vadd.f32 %v802_v0, %v774_v60  ;;  %v613_v6 = vadd.f32 %v612_v43, %v584_v2 }
 0x10a   :  { %1315 = vst [vmem:[%s1656_s3 + $0x8] sm:$0xff] %v1308_v44   ;;  %v815_v8 = vmax.f32 %v623_v5, %v803_v4  ;;  %v624_v11 = vmax.f32 %v432_v7, %v613_v6 }
 0x10c   :  { %v826_v58 = vadd.f32 %v1622_v17, %v815_v8 }
 0x10e   :  { %v776_v9 = vpop.f32.mrf.mxu2  ;;  %v587_v13 = vpop.f32.mrf.mxu0  ;;  %v833_v56 = vmax.f32 %v826_v58, 0.0 }
 0x10f   :  { %v804_v10 = vpop.f32.mrf.mxu3  ;;  %v615_v14 = vpop.f32.mrf.mxu1 }
 0x110   :  { %v805_v12 = vadd.f32 %v804_v10, %v776_v9  ;;  %v616_v49 = vadd.f32 %v615_v14, %v587_v13 }
 0x112   :  { %v816_v15 = vmax.f32 %v624_v11, %v805_v12  ;;  %v625_v21 = vmax.f32 %v433_v52, %v616_v49 }
 0x114   :  { %v827_v16 = vadd.f32 %v1622_v17, %v816_v15 }
 0x116   :  { %v834_v55 = vmax.f32 %v827_v16, 0.0  ;;  %v779_v18 = vpop.f32.mrf.mxu2  ;;  %v589_v23 = vpop.f32.mrf.mxu0 }
 0x117   :  { %v807_v19 = vpop.f32.mrf.mxu3  ;;  %v617_v24 = vpop.f32.mrf.mxu1 }
 0x118   :  { %v1313_v20 = vpack.c.bf16 %v834_v55, %v833_v56  ;;  %v808_v22 = vadd.f32 %v807_v19, %v779_v18 }
 0x11a   :  { %1316 = vst [vmem:[%s1656_s3 + $0x10] sm:$0xff] %v1313_v20   ;;  %v817_v62 = vmax.f32 %v625_v21, %v808_v22 }
 0x11c   :  { %v828_v63 = vadd.f32 %v1622_v17, %v817_v62 }
 0x11e   :  { %v835_v25 = vmax.f32 %v828_v63, 0.0  ;;  %v781_v26 = vpop.f32.mrf.mxu2 }
 0x11f   :  { %v809_v27 = vpop.f32.mrf.mxu3 }
 0x120   :  { %v842_v61 = vpack.c.bf16 %v835_v25, %v835_v25 }
 0x122   :  { %849 = vst [vmem:[%s1656_s3 + $0x18] sm:$0x1] %v842_v61 }

// kernel: lenet_forward.5
= control target key start
LH: loop header
LB: loop body
LE: loop exit
PB: predicated region body
PF: predicated region fallthrough
CT: control target
= control target key end

     0   :  { %s4036_s0 = inlined_call_operand.vmem [shape: bf16[2,3200], index: 0, kind: input, shape index: {}]   ;;  %s4037_s1 = inlined_call_operand.vmem [shape: bf16[3200,128], index: 1, kind: input, shape index: {}]   ;;  %s4038_s2 = inlined_call_operand.vmem [shape: f32[1,128], index: 2, kind: input, shape index: {}]   ;;  %s4039_s3 = inlined_call_operand.vmem [shape: bf16[128,128], index: 3, kind: input, shape index: {}]   ;;  %s4040_s4 = inlined_call_operand.vmem [shape: f32[1,128], index: 4, kind: input, shape index: {}]   ;;  %s4041_s5 = inlined_call_operand.vmem [shape: bf16[128,128], index: 5, kind: input, shape index: {}]   ;;  %s4042_s6 = inlined_call_operand.vmem [shape: f32[1,128], index: 6, kind: input, shape index: {}]   ;;  %s4043_s7 = inlined_call_operand.hbm [shape: f32[2,128], index: 7, kind: output, shape index: {}]  }
   0x1   :  { %v3072_v0 = vld [vmem:[%s4037_s1 + $0x38] sm:$0xff]  ;;  %v3071_v4 = vld [vmem:[%s4037_s1 + $0x30] sm:$0xff]  ;;  %v3070_v8 = vld [vmem:[%s4037_s1 + $0x28] sm:$0xff] }
   0x2   :  { %v3088_v1 = vld [vmem:[%s4037_s1 + $0xb8] sm:$0xff]  ;;  %1693 = vmatpush.bf16.msra.mxu0 %v3072_v0  ;;  %v3087_v5 = vld [vmem:[%s4037_s1 + $0xb0] sm:$0xff]  ;;  %v3086_v9 = vld [vmem:[%s4037_s1 + $0xa8] sm:$0xff] }
   0x3   :  { %v3080_v2 = vld [vmem:[%s4037_s1 + $0x78] sm:$0xff]  ;;  %1719 = vmatpush.bf16.msra.mxu2 %v3088_v1  ;;  %v3079_v6 = vld [vmem:[%s4037_s1 + $0x70] sm:$0xff]  ;;  %v3078_v10 = vld [vmem:[%s4037_s1 + $0x68] sm:$0xff] }
   0x4   :  { %v3096_v3 = vld [vmem:[%s4037_s1 + $0xf8] sm:$0xff]  ;;  %1706 = vmatpush.bf16.msra.mxu1 %v3080_v2  ;;  %v3095_v7 = vld [vmem:[%s4037_s1 + $0xf0] sm:$0xff]  ;;  %v3094_v11 = vld [vmem:[%s4037_s1 + $0xe8] sm:$0xff] }
   0x5   :  { %1732 = vmatpush.bf16.msra.mxu3 %v3096_v3  ;;  %v3069_v12 = vld [vmem:[%s4037_s1 + $0x20] sm:$0xff]  ;;  %v3068_v16 = vld [vmem:[%s4037_s1 + $0x18] sm:$0xff]  ;;  %v3067_v21 = vld [vmem:[%s4037_s1 + $0x10] sm:$0xff] }
   0x6   :  { %1694 = vmatpush.bf16.msra.mxu0 %v3071_v4  ;;  %v3085_v13 = vld [vmem:[%s4037_s1 + $0xa0] sm:$0xff]  ;;  %v3084_v17 = vld [vmem:[%s4037_s1 + $0x98] sm:$0xff]  ;;  %v3083_v22 = vld [vmem:[%s4037_s1 + $0x90] sm:$0xff] }
   0x7   :  { %1720 = vmatpush.bf16.msra.mxu2 %v3087_v5  ;;  %v3077_v14 = vld [vmem:[%s4037_s1 + $0x60] sm:$0xff]  ;;  %v3076_v18 = vld [vmem:[%s4037_s1 + $0x58] sm:$0xff]  ;;  %v3075_v23 = vld [vmem:[%s4037_s1 + $0x50] sm:$0xff] }
   0x8   :  { %1707 = vmatpush.bf16.msra.mxu1 %v3079_v6  ;;  %v3093_v15 = vld [vmem:[%s4037_s1 + $0xe0] sm:$0xff]  ;;  %v3092_v19 = vld [vmem:[%s4037_s1 + $0xd8] sm:$0xff]  ;;  %v3091_v24 = vld [vmem:[%s4037_s1 + $0xd0] sm:$0xff] }
   0x9   :  { %1733 = vmatpush.bf16.msra.mxu3 %v3095_v7  ;;  %v27_v20 = vld [vmem:[%s4036_s0] sm:$0xff] }
   0xa   :  { %1695 = vmatpush.bf16.msra.mxu0 %v3070_v8  ;;  %436 = vst [vmem:[#allocation1] ss:$9 sm:$0xff] %v27_v20 }
   0xb   :  { %1721 = vmatpush.bf16.msra.mxu2 %v3086_v9 }
   0xc   :  { %1708 = vmatpush.bf16.msra.mxu1 %v3078_v10 }
   0xd   :  { %1734 = vmatpush.bf16.msra.mxu3 %v3094_v11 }
   0xe   :  { %1696 = vmatpush.bf16.msra.mxu0 %v3069_v12 }
   0xf   :  { %1722 = vmatpush.bf16.msra.mxu2 %v3085_v13 }
  0x10   :  { %1709 = vmatpush.bf16.msra.mxu1 %v3077_v14 }
  0x11   :  { %1735 = vmatpush.bf16.msra.mxu3 %v3093_v15 }
  0x12   :  { %1697 = vmatpush.bf16.msra.mxu0 %v3068_v16 }
  0x13   :  { %1723 = vmatpush.bf16.msra.mxu2 %v3084_v17 }
  0x14   :  { %1710 = vmatpush.bf16.msra.mxu1 %v3076_v18 }
  0x15   :  { %1736 = vmatpush.bf16.msra.mxu3 %v3092_v19 }
  0x16   :  { %12 = vsyncpa [#allocation3], 0  ;;  %1698 = vmatpush.bf16.msra.mxu0 %v3067_v21  ;;  %v3066_v25 = vld [vmem:[%s4037_s1 + $0x8] sm:$0xff]  ;;  %v3065_v29 = vld [vmem:[%s4037_s1] sm:$0xff]  ;;  %s3311_s23 = smov [#allocation2]  }
  0x17   :  { %1724 = vmatpush.bf16.msra.mxu2 %v3083_v22  ;;  %v3082_v26 = vld [vmem:[%s4037_s1 + $0x88] sm:$0xff]  ;;  %v3081_v30 = vld [vmem:[%s4037_s1 + $0x80] sm:$0xff]  ;;  %v3104_v31 = vld [vmem:[%s4037_s1 + $0x138] sm:$0xff]  ;;  %s2190_s24 = sshll.u32 %s3311_s23, 4  ;;  %s2191_s24 = int_to_ptr.vmem [resolvable:$true] %s2190_s24 }
  0x18   :  { %1711 = vmatpush.bf16.msra.mxu1 %v3075_v23  ;;  %v3074_v27 = vld [vmem:[%s4037_s1 + $0x48] sm:$0xff]  ;;  %v3120_v32 = vld [vmem:[%s4037_s1 + $0x1b8] sm:$0xff]  ;;  %v3073_v33 = vld [vmem:[%s4037_s1 + $0x40] sm:$0xff] }
  0x19   :  { %1737 = vmatpush.bf16.msra.mxu3 %v3091_v24  ;;  %v3090_v28 = vld [vmem:[%s4037_s1 + $0xc8] sm:$0xff]  ;;  %v3089_v34 = vld [vmem:[%s4037_s1 + $0xc0] sm:$0xff]  ;;  %v3112_v35 = vld [vmem:[%s4037_s1 + $0x178] sm:$0xff] }
  0x1a   :  { %1699 = vmatpush.bf16.msra.mxu0 %v3066_v25  ;;  %v3128_v36 = vld [vmem:[%s4037_s1 + $0x1f8] sm:$0xff]  ;;  %v3103_v37 = vld [vmem:[%s4037_s1 + $0x130] sm:$0xff]  ;;  %v437_v40 = vld [vmem:[#allocation1] sm:$0xff] }
  0x1b   :  { %1725 = vmatpush.bf16.msra.mxu2 %v3082_v26  ;;  %v3119_v38 = vld [vmem:[%s4037_s1 + $0x1b0] sm:$0xff]  ;;  %v440_v43 = vld [vmem:[#allocation1 + $0x1b] sm:$0xff]  ;;  %v3102_v45 = vld [vmem:[%s4037_s1 + $0x128] sm:$0xff] }
  0x1c   :  { %1712 = vmatpush.bf16.msra.mxu1 %v3074_v27  ;;  %v439_v39 = vld [vmem:[#allocation1 + $0x12] sm:$0xff]  ;;  %v438_v44 = vld [vmem:[#allocation1 + $0x9] sm:$0xff]  ;;  %v3485_v49 = vld [vmem:[#allocation1 + $0x3f] sm:$0xff] }
  0x1d   :  { %1738 = vmatpush.bf16.msra.mxu3 %v3090_v28  ;;  %v3111_v41 = vld [vmem:[%s4037_s1 + $0x170] sm:$0xff]  ;;  %v3118_v46 = vld [vmem:[%s4037_s1 + $0x1a8] sm:$0xff]  ;;  %v3101_v54 = vld [vmem:[%s4037_s1 + $0x120] sm:$0xff] }
  0x1e   :  { %1700 = vmatpush.bf16.msra.mxu0 %v3065_v29  ;;  %v3127_v42 = vld [vmem:[%s4037_s1 + $0x1f0] sm:$0xff]  ;;  %v3483_v48 = vld [vmem:[#allocation1 + $0x24] sm:$0xff]  ;;  %v3100_v58 = vld [vmem:[%s4037_s1 + $0x118] sm:$0xff] }
  0x1f   :  { %1726 = vmatpush.bf16.msra.mxu2 %v3081_v30  ;;  %v3481_v47 = vld [vmem:[#allocation1 + $0x36] sm:$0xff]  ;;  %v28_v50 = vld [vmem:[%s4036_s0 + $0x8] sm:$0xff]  ;;  %v3117_v55 = vld [vmem:[%s4037_s1 + $0x1a0] sm:$0xff] }
  0x20   :  { %1713 = vmatpush.bf16.msra.mxu1 %v3073_v33  ;;  %v3490_v51 = vld [vmem:[#allocation1 + $0x2d] sm:$0xff]  ;;  %v3109_v56 = vld [vmem:[%s4037_s1 + $0x160] sm:$0xff]  ;;  %v3116_v59 = vld [vmem:[%s4037_s1 + $0x198] sm:$0xff] }
  0x21   :  { %1739 = vmatpush.bf16.msra.mxu3 %v3089_v34  ;;  %1701 = vmatmul.bf16.vlgmr.msra.gmra.mxu0 %v437_v40  ;;  %v3110_v52 = vld [vmem:[%s4037_s1 + $0x168] sm:$0xff]  ;;  %446 = vst [vmem:[#allocation1] ss:$9 sm:$0xff] %v28_v50  ;;  %v3125_v57 = vld [vmem:[%s4037_s1 + $0x1e0] sm:$0xff]  ;;  %v3108_v60 = vld [vmem:[%s4037_s1 + $0x158] sm:$0xff] }
  0x22   :  { %1745 = vmatpush.bf16.msrb.mxu0 %v3104_v31  ;;  %1727 = vmatmul.bf16.vlgmr.msra.gmra.mxu2 %v439_v39  ;;  %v3126_v53 = vld [vmem:[%s4037_s1 + $0x1e8] sm:$0xff]  ;;  %v3124_v61 = vld [vmem:[%s4037_s1 + $0x1d8] sm:$0xff]  ;;  %v3099_v62 = vld [vmem:[%s4037_s1 + $0x110] sm:$0xff] }
  0x23   :  { %1771 = vmatpush.bf16.msrb.mxu2 %v3120_v32  ;;  %1714 = vmatmul.bf16.vlgmr.msra.gmra.mxu1 %v438_v44  ;;  %v3115_v63 = vld [vmem:[%s4037_s1 + $0x190] sm:$0xff]  ;;  %v3098_v2 = vld [vmem:[%s4037_s1 + $0x108] sm:$0xff]  ;;  %v3097_v6 = vld [vmem:[%s4037_s1 + $0x100] sm:$0xff] }
  0x24   :  { %1758 = vmatpush.bf16.msrb.mxu1 %v3112_v35  ;;  %1740 = vmatmul.bf16.vlgmr.msra.gmra.mxu3 %v440_v43  ;;  %v3107_v0 = vld [vmem:[%s4037_s1 + $0x150] sm:$0xff]  ;;  %v3114_v3 = vld [vmem:[%s4037_s1 + $0x188] sm:$0xff]  ;;  %v3113_v7 = vld [vmem:[%s4037_s1 + $0x180] sm:$0xff] }
  0x25   :  { %1784 = vmatpush.bf16.msrb.mxu3 %v3128_v36  ;;  %v3123_v1 = vld [vmem:[%s4037_s1 + $0x1d0] sm:$0xff]  ;;  %v3106_v4 = vld [vmem:[%s4037_s1 + $0x148] sm:$0xff]  ;;  %v3136_v8 = vld [vmem:[%s4037_s1 + $0x238] sm:$0xff] }
  0x26   :  { %1746 = vmatpush.bf16.msrb.mxu0 %v3103_v37  ;;  %v3122_v5 = vld [vmem:[%s4037_s1 + $0x1c8] sm:$0xff]  ;;  %v3152_v9 = vld [vmem:[%s4037_s1 + $0x2b8] sm:$0xff]  ;;  %v3105_v10 = vld [vmem:[%s4037_s1 + $0x140] sm:$0xff] }
  0x27   :  { %1772 = vmatpush.bf16.msrb.mxu2 %v3119_v38  ;;  %v3121_v11 = vld [vmem:[%s4037_s1 + $0x1c0] sm:$0xff]  ;;  %v3144_v12 = vld [vmem:[%s4037_s1 + $0x278] sm:$0xff]  ;;  %v3135_v14 = vld [vmem:[%s4037_s1 + $0x230] sm:$0xff] }
  0x28   :  { %1759 = vmatpush.bf16.msrb.mxu1 %v3111_v41  ;;  %v3160_v13 = vld [vmem:[%s4037_s1 + $0x2f8] sm:$0xff]  ;;  %v3151_v15 = vld [vmem:[%s4037_s1 + $0x2b0] sm:$0xff]  ;;  %v3134_v18 = vld [vmem:[%s4037_s1 + $0x228] sm:$0xff] }
  0x29   :  { %1785 = vmatpush.bf16.msrb.mxu3 %v3127_v42  ;;  %v3143_v16 = vld [vmem:[%s4037_s1 + $0x270] sm:$0xff]  ;;  %v3150_v19 = vld [vmem:[%s4037_s1 + $0x2a8] sm:$0xff]  ;;  %v3133_v22 = vld [vmem:[%s4037_s1 + $0x220] sm:$0xff] }
  0x2a   :  { %1747 = vmatpush.bf16.msrb.mxu0 %v3102_v45  ;;  %v3159_v17 = vld [vmem:[%s4037_s1 + $0x2f0] sm:$0xff]  ;;  %v3142_v20 = vld [vmem:[%s4037_s1 + $0x268] sm:$0xff]  ;;  %v3149_v23 = vld [vmem:[%s4037_s1 + $0x2a0] sm:$0xff] }
  0x2b   :  { %1773 = vmatpush.bf16.msrb.mxu2 %v3118_v46  ;;  %v3158_v21 = vld [vmem:[%s4037_s1 + $0x2e8] sm:$0xff]  ;;  %v3141_v24 = vld [vmem:[%s4037_s1 + $0x260] sm:$0xff]  ;;  %v3132_v26 = vld [vmem:[%s4037_s1 + $0x218] sm:$0xff] }
  0x2c   :  { %1760 = vmatpush.bf16.msrb.mxu1 %v3110_v52  ;;  %v3157_v25 = vld [vmem:[%s4037_s1 + $0x2e0] sm:$0xff]  ;;  %v3148_v27 = vld [vmem:[%s4037_s1 + $0x298] sm:$0xff]  ;;  %v3131_v30 = vld [vmem:[%s4037_s1 + $0x210] sm:$0xff] }
  0x2d   :  { %1786 = vmatpush.bf16.msrb.mxu3 %v3126_v53  ;;  %v3140_v28 = vld [vmem:[%s4037_s1 + $0x258] sm:$0xff]  ;;  %v3147_v31 = vld [vmem:[%s4037_s1 + $0x290] sm:$0xff]  ;;  %v3130_v34 = vld [vmem:[%s4037_s1 + $0x208] sm:$0xff] }
  0x2e   :  { %1748 = vmatpush.bf16.msrb.mxu0 %v3101_v54  ;;  %v3156_v29 = vld [vmem:[%s4037_s1 + $0x2d8] sm:$0xff]  ;;  %v3139_v32 = vld [vmem:[%s4037_s1 + $0x250] sm:$0xff]  ;;  %v3146_v35 = vld [vmem:[%s4037_s1 + $0x288] sm:$0xff] }
  0x2f   :  { %1774 = vmatpush.bf16.msrb.mxu2 %v3117_v55  ;;  %v3155_v33 = vld [vmem:[%s4037_s1 + $0x2d0] sm:$0xff]  ;;  %v3138_v36 = vld [vmem:[%s4037_s1 + $0x248] sm:$0xff]  ;;  %v3129_v38 = vld [vmem:[%s4037_s1 + $0x200] sm:$0xff] }
  0x30   :  { %1761 = vmatpush.bf16.msrb.mxu1 %v3109_v56  ;;  %v3154_v37 = vld [vmem:[%s4037_s1 + $0x2c8] sm:$0xff]  ;;  %v3145_v39 = vld [vmem:[%s4037_s1 + $0x280] sm:$0xff]  ;;  %v3168_v40 = vld [vmem:[%s4037_s1 + $0x338] sm:$0xff] }
  0x31   :  { %1787 = vmatpush.bf16.msrb.mxu3 %v3125_v57  ;;  %v3184_v41 = vld [vmem:[%s4037_s1 + $0x3b8] sm:$0xff]  ;;  %v3137_v42 = vld [vmem:[%s4037_s1 + $0x240] sm:$0xff]  ;;  %v3167_v50 = vld [vmem:[%s4037_s1 + $0x330] sm:$0xff] }
  0x32   :  { %1749 = vmatpush.bf16.msrb.mxu0 %v3100_v58  ;;  %v3153_v43 = vld [vmem:[%s4037_s1 + $0x2c0] sm:$0xff]  ;;  %v3176_v44 = vld [vmem:[%s4037_s1 + $0x378] sm:$0xff]  ;;  %v3175_v52 = vld [vmem:[%s4037_s1 + $0x370] sm:$0xff] }
  0x33   :  { %1775 = vmatpush.bf16.msrb.mxu2 %v3116_v59  ;;  %v447_v45 = vld [vmem:[#allocation1] sm:$0xff]  ;;  %v449_v46 = vld [vmem:[#allocation1 + $0x12] sm:$0xff]  ;;  %v3166_v54 = vld [vmem:[%s4037_s1 + $0x328] sm:$0xff] }
  0x34   :  { %1762 = vmatpush.bf16.msrb.mxu1 %v3108_v60  ;;  %v3191_v53 = vld [vmem:[%s4037_s1 + $0x3f0] sm:$0xff]  ;;  %v3182_v55 = vld [vmem:[%s4037_s1 + $0x3a8] sm:$0xff]  ;;  %v3165_v58 = vld [vmem:[%s4037_s1 + $0x320] sm:$0xff] }
  0x35   :  { %1788 = vmatpush.bf16.msrb.mxu3 %v3124_v61  ;;  %v3174_v56 = vld [vmem:[%s4037_s1 + $0x368] sm:$0xff]  ;;  %v3181_v59 = vld [vmem:[%s4037_s1 + $0x3a0] sm:$0xff] }
  0x36   :  { %1750 = vmatpush.bf16.msrb.mxu0 %v3099_v62  ;;  %v3190_v57 = vld [vmem:[%s4037_s1 + $0x3e8] sm:$0xff]  ;;  %v3173_v60 = vld [vmem:[%s4037_s1 + $0x360] sm:$0xff]  ;;  %v3164_v62 = vld [vmem:[%s4037_s1 + $0x318] sm:$0xff] }
  0x37   :  { %1776 = vmatpush.bf16.msrb.mxu2 %v3115_v63  ;;  %v3189_v61 = vld [vmem:[%s4037_s1 + $0x3e0] sm:$0xff]  ;;  %v3180_v63 = vld [vmem:[%s4037_s1 + $0x398] sm:$0xff] }
  0x38   :  { %1763 = vmatpush.bf16.msrb.mxu1 %v3107_v0  ;;  %v3172_v0 = vld [vmem:[%s4037_s1 + $0x358] sm:$0xff] }
  0x39   :  { %1789 = vmatpush.bf16.msrb.mxu3 %v3123_v1  ;;  %v3188_v1 = vld [vmem:[%s4037_s1 + $0x3d8] sm:$0xff] }
  0x3a   :  { %1751 = vmatpush.bf16.msrb.mxu0 %v3098_v2  ;;  %v3163_v2 = vld [vmem:[%s4037_s1 + $0x310] sm:$0xff] }
  0x3b   :  { %1777 = vmatpush.bf16.msrb.mxu2 %v3114_v3  ;;  %v3179_v3 = vld [vmem:[%s4037_s1 + $0x390] sm:$0xff] }
  0x3c   :  { %1764 = vmatpush.bf16.msrb.mxu1 %v3106_v4  ;;  %v3171_v4 = vld [vmem:[%s4037_s1 + $0x350] sm:$0xff] }
  0x3d   :  { %1790 = vmatpush.bf16.msrb.mxu3 %v3122_v5  ;;  %v3187_v5 = vld [vmem:[%s4037_s1 + $0x3d0] sm:$0xff] }
  0x3e   :  { %1752 = vmatpush.bf16.msrb.mxu0 %v3097_v6  ;;  %v3162_v6 = vld [vmem:[%s4037_s1 + $0x308] sm:$0xff] }
  0x3f   :  { %1778 = vmatpush.bf16.msrb.mxu2 %v3113_v7  ;;  %v3178_v7 = vld [vmem:[%s4037_s1 + $0x388] sm:$0xff] }
  0x40   :  { %1765 = vmatpush.bf16.msrb.mxu1 %v3105_v10  ;;  %v452_v10 = vld [vmem:[#allocation1 + $0x2d] sm:$0xff] }
  0x41   :  { %1791 = vmatpush.bf16.msrb.mxu3 %v3121_v11  ;;  %1753 = vmatmul.bf16.vlgmr.msrb.gmra.mxu0 %v3483_v48  ;;  %v448_v48 = vld [vmem:[#allocation1 + $0x9] sm:$0xff]  ;;  %v454_v11 = vld [vmem:[#allocation1 + $0x3f] sm:$0xff] }
  0x42   :  { %1797 = vmatpush.bf16.msra.mxu0 %v3136_v8  ;;  %1779 = vmatmul.bf16.vlgmr.msrb.gmra.mxu2 %v3481_v47  ;;  %v3192_v47 = vld [vmem:[%s4037_s1 + $0x3f8] sm:$0xff]  ;;  %v451_v8 = vld [vmem:[#allocation1 + $0x24] sm:$0xff] }
  0x43   :  { %1823 = vmatpush.bf16.msra.mxu2 %v3152_v9  ;;  %1766 = vmatmul.bf16.vlgmr.msrb.gmra.mxu1 %v3490_v51  ;;  %v3183_v51 = vld [vmem:[%s4037_s1 + $0x3b0] sm:$0xff] }
  0x44   :  { %1810 = vmatpush.bf16.msra.mxu1 %v3144_v12  ;;  %1792 = vmatmul.bf16.vlgmr.msrb.gmra.mxu3 %v3485_v49  ;;  %v450_v49 = vld [vmem:[#allocation1 + $0x1b] sm:$0xff]  ;;  %v29_v12 = vld [vmem:[%s4036_s0 + $0x10] sm:$0xff] }
  0x45   :  { %1836 = vmatpush.bf16.msra.mxu3 %v3160_v13  ;;  %v453_v9 = vld [vmem:[#allocation1 + $0x36] sm:$0xff]  ;;  %v3170_v13 = vld [vmem:[%s4037_s1 + $0x348] sm:$0xff] }
  0x46   :  { %1798 = vmatpush.bf16.msra.mxu0 %v3135_v14  ;;  %456 = vst [vmem:[#allocation1] ss:$9 sm:$0xff] %v29_v12  ;;  %v3186_v14 = vld [vmem:[%s4037_s1 + $0x3c8] sm:$0xff]  ;;  %v3244_v12 = vld [vmem:[%s4037_s1 + $0x598] sm:$0xff] }
  0x47   :  { %1824 = vmatpush.bf16.msra.mxu2 %v3151_v15  ;;  %v3161_v15 = vld [vmem:[%s4037_s1 + $0x300] sm:$0xff] }
  0x48   :  { %1811 = vmatpush.bf16.msra.mxu1 %v3143_v16  ;;  %v3177_v16 = vld [vmem:[%s4037_s1 + $0x380] sm:$0xff] }
  0x49   :  { %1837 = vmatpush.bf16.msra.mxu3 %v3159_v17  ;;  %v3200_v17 = vld [vmem:[%s4037_s1 + $0x438] sm:$0xff] }
  0x4a   :  { %1799 = vmatpush.bf16.msra.mxu0 %v3134_v18  ;;  %v3216_v18 = vld [vmem:[%s4037_s1 + $0x4b8] sm:$0xff] }
  0x4b   :  { %1825 = vmatpush.bf16.msra.mxu2 %v3150_v19  ;;  %v3169_v19 = vld [vmem:[%s4037_s1 + $0x340] sm:$0xff] }
  0x4c   :  { %1812 = vmatpush.bf16.msra.mxu1 %v3142_v20  ;;  %v3185_v20 = vld [vmem:[%s4037_s1 + $0x3c0] sm:$0xff] }
  0x4d   :  { %1838 = vmatpush.bf16.msra.mxu3 %v3158_v21  ;;  %v3208_v21 = vld [vmem:[%s4037_s1 + $0x478] sm:$0xff] }
  0x4e   :  { %1800 = vmatpush.bf16.msra.mxu0 %v3133_v22  ;;  %v3224_v22 = vld [vmem:[%s4037_s1 + $0x4f8] sm:$0xff] }
  0x4f   :  { %1826 = vmatpush.bf16.msra.mxu2 %v3149_v23  ;;  %v3199_v23 = vld [vmem:[%s4037_s1 + $0x430] sm:$0xff] }
  0x50   :  { %1813 = vmatpush.bf16.msra.mxu1 %v3141_v24  ;;  %v3215_v24 = vld [vmem:[%s4037_s1 + $0x4b0] sm:$0xff] }
  0x51   :  { %1839 = vmatpush.bf16.msra.mxu3 %v3157_v25  ;;  %v3207_v25 = vld [vmem:[%s4037_s1 + $0x470] sm:$0xff] }
  0x52   :  { %1801 = vmatpush.bf16.msra.mxu0 %v3132_v26  ;;  %v3223_v26 = vld [vmem:[%s4037_s1 + $0x4f0] sm:$0xff] }
  0x53   :  { %1827 = vmatpush.bf16.msra.mxu2 %v3148_v27  ;;  %v3198_v27 = vld [vmem:[%s4037_s1 + $0x428] sm:$0xff] }
  0x54   :  { %1814 = vmatpush.bf16.msra.mxu1 %v3140_v28  ;;  %v3214_v28 = vld [vmem:[%s4037_s1 + $0x4a8] sm:$0xff] }
  0x55   :  { %1840 = vmatpush.bf16.msra.mxu3 %v3156_v29  ;;  %v3206_v29 = vld [vmem:[%s4037_s1 + $0x468] sm:$0xff] }
  0x56   :  { %1802 = vmatpush.bf16.msra.mxu0 %v3131_v30  ;;  %v3222_v30 = vld [vmem:[%s4037_s1 + $0x4e8] sm:$0xff] }
  0x57   :  { %1828 = vmatpush.bf16.msra.mxu2 %v3147_v31  ;;  %v3197_v31 = vld [vmem:[%s4037_s1 + $0x420] sm:$0xff] }
  0x58   :  { %1815 = vmatpush.bf16.msra.mxu1 %v3139_v32  ;;  %v3213_v32 = vld [vmem:[%s4037_s1 + $0x4a0] sm:$0xff] }
  0x59   :  { %1841 = vmatpush.bf16.msra.mxu3 %v3155_v33  ;;  %v3205_v33 = vld [vmem:[%s4037_s1 + $0x460] sm:$0xff] }
  0x5a   :  { %1803 = vmatpush.bf16.msra.mxu0 %v3130_v34  ;;  %v3221_v34 = vld [vmem:[%s4037_s1 + $0x4e0] sm:$0xff] }
  0x5b   :  { %1829 = vmatpush.bf16.msra.mxu2 %v3146_v35  ;;  %v3196_v35 = vld [vmem:[%s4037_s1 + $0x418] sm:$0xff] }
  0x5c   :  { %1816 = vmatpush.bf16.msra.mxu1 %v3138_v36  ;;  %v3212_v36 = vld [vmem:[%s4037_s1 + $0x498] sm:$0xff] }
  0x5d   :  { %1842 = vmatpush.bf16.msra.mxu3 %v3154_v37  ;;  %v3204_v37 = vld [vmem:[%s4037_s1 + $0x458] sm:$0xff] }
  0x5e   :  { %1804 = vmatpush.bf16.msra.mxu0 %v3129_v38  ;;  %v3220_v38 = vld [vmem:[%s4037_s1 + $0x4d8] sm:$0xff] }
  0x5f   :  { %1830 = vmatpush.bf16.msra.mxu2 %v3145_v39  ;;  %v3195_v39 = vld [vmem:[%s4037_s1 + $0x410] sm:$0xff] }
  0x60   :  { %1817 = vmatpush.bf16.msra.mxu1 %v3137_v42  ;;  %v3219_v42 = vld [vmem:[%s4037_s1 + $0x4d0] sm:$0xff] }
  0x61   :  { %1843 = vmatpush.bf16.msra.mxu3 %v3153_v43  ;;  %1805 = vmatmul.bf16.vlgmr.msra.gmra.mxu0 %v447_v45  ;;  %v3194_v43 = vld [vmem:[%s4037_s1 + $0x408] sm:$0xff] }
  0x62   :  { %1849 = vmatpush.bf16.msrb.mxu0 %v3168_v40  ;;  %1831 = vmatmul.bf16.vlgmr.msra.gmra.mxu2 %v449_v46  ;;  %v3211_v40 = vld [vmem:[%s4037_s1 + $0x490] sm:$0xff]  ;;  %v3202_v45 = vld [vmem:[%s4037_s1 + $0x448] sm:$0xff] }
  0x63   :  { %1875 = vmatpush.bf16.msrb.mxu2 %v3184_v41  ;;  %1818 = vmatmul.bf16.vlgmr.msra.gmra.mxu1 %v448_v48  ;;  %v3203_v41 = vld [vmem:[%s4037_s1 + $0x450] sm:$0xff]  ;;  %v3218_v46 = vld [vmem:[%s4037_s1 + $0x4c8] sm:$0xff]  ;;  %v3209_v48 = vld [vmem:[%s4037_s1 + $0x480] sm:$0xff] }
  0x64   :  { %1862 = vmatpush.bf16.msrb.mxu1 %v3176_v44  ;;  %1844 = vmatmul.bf16.vlgmr.msra.gmra.mxu3 %v450_v49  ;;  %v3210_v44 = vld [vmem:[%s4037_s1 + $0x488] sm:$0xff]  ;;  %v3232_v49 = vld [vmem:[%s4037_s1 + $0x538] sm:$0xff] }
  0x65   :  { %1888 = vmatpush.bf16.msrb.mxu3 %v3192_v47  ;;  %v3193_v47 = vld [vmem:[%s4037_s1 + $0x400] sm:$0xff] }
  0x66   :  { %1850 = vmatpush.bf16.msrb.mxu0 %v3167_v50  ;;  %v3248_v50 = vld [vmem:[%s4037_s1 + $0x5b8] sm:$0xff] }
  0x67   :  { %1876 = vmatpush.bf16.msrb.mxu2 %v3183_v51  ;;  %v3201_v51 = vld [vmem:[%s4037_s1 + $0x440] sm:$0xff] }
  0x68   :  { %1863 = vmatpush.bf16.msrb.mxu1 %v3175_v52  ;;  %v3217_v52 = vld [vmem:[%s4037_s1 + $0x4c0] sm:$0xff] }
  0x69   :  { %1889 = vmatpush.bf16.msrb.mxu3 %v3191_v53  ;;  %v3240_v53 = vld [vmem:[%s4037_s1 + $0x578] sm:$0xff] }
  0x6a   :  { %1851 = vmatpush.bf16.msrb.mxu0 %v3166_v54  ;;  %v457_v54 = vld [vmem:[#allocation1] sm:$0xff] }
  0x6b   :  { %1877 = vmatpush.bf16.msrb.mxu2 %v3182_v55  ;;  %v459_v55 = vld [vmem:[#allocation1 + $0x12] sm:$0xff] }
  0x6c   :  { %1864 = vmatpush.bf16.msrb.mxu1 %v3174_v56  ;;  %v3256_v56 = vld [vmem:[%s4037_s1 + $0x5f8] sm:$0xff] }
  0x6d   :  { %1890 = vmatpush.bf16.msrb.mxu3 %v3190_v57  ;;  %v458_v57 = vld [vmem:[#allocation1 + $0x9] sm:$0xff] }
  0x6e   :  { %1852 = vmatpush.bf16.msrb.mxu0 %v3165_v58  ;;  %v460_v58 = vld [vmem:[#allocation1 + $0x1b] sm:$0xff] }
  0x6f   :  { %1878 = vmatpush.bf16.msrb.mxu2 %v3181_v59  ;;  %v3231_v59 = vld [vmem:[%s4037_s1 + $0x530] sm:$0xff] }
  0x70   :  { %1865 = vmatpush.bf16.msrb.mxu1 %v3173_v60  ;;  %v3247_v60 = vld [vmem:[%s4037_s1 + $0x5b0] sm:$0xff] }
  0x71   :  { %1891 = vmatpush.bf16.msrb.mxu3 %v3189_v61  ;;  %v3239_v61 = vld [vmem:[%s4037_s1 + $0x570] sm:$0xff] }
  0x72   :  { %1853 = vmatpush.bf16.msrb.mxu0 %v3164_v62  ;;  %v3255_v62 = vld [vmem:[%s4037_s1 + $0x5f0] sm:$0xff] }
  0x73   :  { %1879 = vmatpush.bf16.msrb.mxu2 %v3180_v63  ;;  %v3230_v63 = vld [vmem:[%s4037_s1 + $0x528] sm:$0xff] }
  0x74   :  { %1866 = vmatpush.bf16.msrb.mxu1 %v3172_v0  ;;  %v3246_v0 = vld [vmem:[%s4037_s1 + $0x5a8] sm:$0xff] }
  0x75   :  { %1892 = vmatpush.bf16.msrb.mxu3 %v3188_v1  ;;  %v3238_v1 = vld [vmem:[%s4037_s1 + $0x568] sm:$0xff] }
  0x76   :  { %1854 = vmatpush.bf16.msrb.mxu0 %v3163_v2  ;;  %v3254_v2 = vld [vmem:[%s4037_s1 + $0x5e8] sm:$0xff] }
  0x77   :  { %1880 = vmatpush.bf16.msrb.mxu2 %v3179_v3  ;;  %v3282_v3 = vld [vmem:[%s4038_s2] ss:$0 sm:$0xff] }
  0x78   :  { %1867 = vmatpush.bf16.msrb.mxu1 %v3171_v4  ;;  %v3229_v4 = vld [vmem:[%s4037_s1 + $0x520] sm:$0xff] }
  0x79   :  { %1893 = vmatpush.bf16.msrb.mxu3 %v3187_v5  ;;  %v3245_v5 = vld [vmem:[%s4037_s1 + $0x5a0] sm:$0xff] }
  0x7a   :  { %1855 = vmatpush.bf16.msrb.mxu0 %v3162_v6 }
  0x7b   :  { %1881 = vmatpush.bf16.msrb.mxu2 %v3178_v7  ;;  %v3237_v7 = vld [vmem:[%s4037_s1 + $0x560] sm:$0xff] }
  0x7c   :  { %1868 = vmatpush.bf16.msrb.mxu1 %v3170_v13 }
  0x7d   :  { %1894 = vmatpush.bf16.msrb.mxu3 %v3186_v14  ;;  %v3236_v14 = vld [vmem:[%s4037_s1 + $0x558] sm:$0xff] }
  0x7e   :  { %1856 = vmatpush.bf16.msrb.mxu0 %v3161_v15  ;;  %v3252_v15 = vld [vmem:[%s4037_s1 + $0x5d8] sm:$0xff] }
  0x7f   :  { %1882 = vmatpush.bf16.msrb.mxu2 %v3177_v16 }
  0x80   :  { %1869 = vmatpush.bf16.msrb.mxu1 %v3169_v19 }
  0x81   :  { %1895 = vmatpush.bf16.msrb.mxu3 %v3185_v20  ;;  %1857 = vmatmul.bf16.vlgmr.msrb.gmra.mxu0 %v451_v8  ;;  %v3253_v8 = vld [vmem:[%s4037_s1 + $0x5e0] sm:$0xff] }
  0x82   :  { %1901 = vmatpush.bf16.msra.mxu0 %v3200_v17  ;;  %1883 = vmatmul.bf16.vlgmr.msrb.gmra.mxu2 %v453_v9  ;;  %v3227_v17 = vld [vmem:[%s4037_s1 + $0x510] sm:$0xff] }
  0x83   :  { %1927 = vmatpush.bf16.msra.mxu2 %v3216_v18  ;;  %1870 = vmatmul.bf16.vlgmr.msrb.gmra.mxu1 %v452_v10  ;;  %v3243_v18 = vld [vmem:[%s4037_s1 + $0x590] sm:$0xff] }
  0x84   :  { %1914 = vmatpush.bf16.msra.mxu1 %v3208_v21  ;;  %1896 = vmatmul.bf16.vlgmr.msrb.gmra.mxu3 %v454_v11  ;;  %v3228_v11 = vld [vmem:[%s4037_s1 + $0x518] sm:$0xff] }
  0x85   :  { %1940 = vmatpush.bf16.msra.mxu3 %v3224_v22  ;;  %v3235_v22 = vld [vmem:[%s4037_s1 + $0x550] sm:$0xff] }
  0x86   :  { %1902 = vmatpush.bf16.msra.mxu0 %v3199_v23  ;;  %v3251_v23 = vld [vmem:[%s4037_s1 + $0x5d0] sm:$0xff] }
  0x87   :  { %1928 = vmatpush.bf16.msra.mxu2 %v3215_v24  ;;  %v3226_v24 = vld [vmem:[%s4037_s1 + $0x508] sm:$0xff] }
  0x88   :  { %1915 = vmatpush.bf16.msra.mxu1 %v3207_v25 }
  0x89   :  { %1941 = vmatpush.bf16.msra.mxu3 %v3223_v26  ;;  %v3242_v26 = vld [vmem:[%s4037_s1 + $0x588] sm:$0xff] }
  0x8a   :  { %1903 = vmatpush.bf16.msra.mxu0 %v3198_v27  ;;  %v461_v27 = vld [vmem:[#allocation1 + $0x24] sm:$0xff] }
  0x8b   :  { %1929 = vmatpush.bf16.msra.mxu2 %v3214_v28  ;;  %v463_v28 = vld [vmem:[#allocation1 + $0x36] sm:$0xff] }
  0x8c   :  { %1916 = vmatpush.bf16.msra.mxu1 %v3206_v29 }
  0x8d   :  { %1942 = vmatpush.bf16.msra.mxu3 %v3222_v30  ;;  %v462_v30 = vld [vmem:[#allocation1 + $0x2d] sm:$0xff] }
  0x8e   :  { %1904 = vmatpush.bf16.msra.mxu0 %v3197_v31  ;;  %v464_v31 = vld [vmem:[#allocation1 + $0x3f] sm:$0xff] }
  0x8f   :  { %1930 = vmatpush.bf16.msra.mxu2 %v3213_v32  ;;  %v30_v32 = vld [vmem:[%s4036_s0 + $0x18] sm:$0x1] }
  0x90   :  { %1917 = vmatpush.bf16.msra.mxu1 %v3205_v33  ;;  %466 = vst [vmem:[#allocation1] ss:$9 sm:$0xff] %v30_v32  ;;  %v3234_v33 = vld [vmem:[%s4037_s1 + $0x548] sm:$0xff] }
  0x91   :  { %1943 = vmatpush.bf16.msra.mxu3 %v3221_v34  ;;  %v3250_v34 = vld [vmem:[%s4037_s1 + $0x5c8] sm:$0xff] }
  0x92   :  { %1905 = vmatpush.bf16.msra.mxu0 %v3196_v35 }
  0x93   :  { %1931 = vmatpush.bf16.msra.mxu2 %v3212_v36  ;;  %v3225_v36 = vld [vmem:[%s4037_s1 + $0x500] sm:$0xff] }
  0x94   :  { %1918 = vmatpush.bf16.msra.mxu1 %v3204_v37  ;;  %v3241_v37 = vld [vmem:[%s4037_s1 + $0x580] sm:$0xff] }
  0x95   :  { %1944 = vmatpush.bf16.msra.mxu3 %v3220_v38  ;;  %v3264_v38 = vld [vmem:[%s4037_s1 + $0x638] sm:$0xff] }
  0x96   :  { %1906 = vmatpush.bf16.msra.mxu0 %v3195_v39 }
  0x97   :  { %1932 = vmatpush.bf16.msra.mxu2 %v3211_v40  ;;  %v3233_v40 = vld [vmem:[%s4037_s1 + $0x540] sm:$0xff] }
  0x98   :  { %1919 = vmatpush.bf16.msra.mxu1 %v3203_v41  ;;  %v3249_v41 = vld [vmem:[%s4037_s1 + $0x5c0] sm:$0xff] }
  0x99   :  { %1945 = vmatpush.bf16.msra.mxu3 %v3219_v42  ;;  %v3263_v42 = vld [vmem:[%s4037_s1 + $0x630] sm:$0xff] }
  0x9a   :  { %1907 = vmatpush.bf16.msra.mxu0 %v3194_v43  ;;  %v3262_v43 = vld [vmem:[%s4037_s1 + $0x628] sm:$0xff] }
  0x9b   :  { %1933 = vmatpush.bf16.msra.mxu2 %v3210_v44  ;;  %v3261_v44 = vld [vmem:[%s4037_s1 + $0x620] sm:$0xff] }
  0x9c   :  { %1920 = vmatpush.bf16.msra.mxu1 %v3202_v45 }
  0x9d   :  { %1946 = vmatpush.bf16.msra.mxu3 %v3218_v46 }
  0x9e   :  { %1908 = vmatpush.bf16.msra.mxu0 %v3193_v47  ;;  %v1702_v6 = vpop.f32.mrf.mxu0 }
  0x9f   :  { %1934 = vmatpush.bf16.msra.mxu2 %v3209_v48  ;;  %v1703_v9 = vadd.f32 %v3282_v3, %v1702_v6 }
  0xa0   :  { %1921 = vmatpush.bf16.msra.mxu1 %v3201_v51  ;;  %v1715_v10 = vpop.f32.mrf.mxu1 }
  0xa1   :  { %1947 = vmatpush.bf16.msra.mxu3 %v3217_v52  ;;  %1909 = vmatmul.bf16.vlgmr.msra.gmra.mxu0 %v457_v54  ;;  %v1716_v13 = vadd.f32 %v1715_v10, %v1703_v9  ;;  %v3259_v52 = vld [vmem:[%s4037_s1 + $0x610] sm:$0xff] }
  0xa2   :  { %1953 = vmatpush.bf16.msrb.mxu0 %v3232_v49  ;;  %1935 = vmatmul.bf16.vlgmr.msra.gmra.mxu2 %v459_v55  ;;  %v3260_v49 = vld [vmem:[%s4037_s1 + $0x618] sm:$0xff] }
  0xa3   :  { %1979 = vmatpush.bf16.msrb.mxu2 %v3248_v50  ;;  %1922 = vmatmul.bf16.vlgmr.msra.gmra.mxu1 %v458_v57  ;;  %v3258_v57 = vld [vmem:[%s4037_s1 + $0x608] sm:$0xff] }
  0xa4   :  { %1966 = vmatpush.bf16.msrb.mxu1 %v3240_v53  ;;  %1948 = vmatmul.bf16.vlgmr.msra.gmra.mxu3 %v460_v58 }
  0xa5   :  { %1992 = vmatpush.bf16.msrb.mxu3 %v3256_v56  ;;  %v1728_v16 = vpop.f32.mrf.mxu2 }
  0xa6   :  { %1954 = vmatpush.bf16.msrb.mxu0 %v3231_v59  ;;  %v1729_v19 = vadd.f32 %v1728_v16, %v1716_v13  ;;  %v1704_v21 = vpop.f32.mrf.mxu0  ;;  %v3257_v59 = vld [vmem:[%s4037_s1 + $0x600] sm:$0xff] }
  0xa7   :  { %1980 = vmatpush.bf16.msrb.mxu2 %v3247_v60  ;;  %v1741_v20 = vpop.f32.mrf.mxu3 }
  0xa8   :  { %1967 = vmatpush.bf16.msrb.mxu1 %v3239_v61  ;;  %v1742_v25 = vadd.f32 %v1741_v20, %v1729_v19  ;;  %v1717_v29 = vpop.f32.mrf.mxu1  ;;  %v467_v61 = vld [vmem:[#allocation1] sm:$0xff] }
  0xa9   :  { %1993 = vmatpush.bf16.msrb.mxu3 %v3255_v62  ;;  %v3270_v29 = vld [vmem:[%s4039_s3 + $0x28] sm:$0xff] }
  0xaa   :  { %1955 = vmatpush.bf16.msrb.mxu0 %v3230_v63 }
  0xab   :  { %1981 = vmatpush.bf16.msrb.mxu2 %v3246_v0 }
  0xac   :  { %1968 = vmatpush.bf16.msrb.mxu1 %v3238_v1 }
  0xad   :  { %1994 = vmatpush.bf16.msrb.mxu3 %v3254_v2  ;;  %v1730_v35 = vpop.f32.mrf.mxu2 }
  0xae   :  { %1956 = vmatpush.bf16.msrb.mxu0 %v3229_v4  ;;  %v3267_v35 = vld [vmem:[%s4039_s3 + $0x10] sm:$0xff] }
  0xaf   :  { %1982 = vmatpush.bf16.msrb.mxu2 %v3245_v5  ;;  %v1743_v39 = vpop.f32.mrf.mxu3 }
  0xb0   :  { %1969 = vmatpush.bf16.msrb.mxu1 %v3237_v7 }
  0xb1   :  { %1995 = vmatpush.bf16.msrb.mxu3 %v3253_v8 }
  0xb2   :  { %1957 = vmatpush.bf16.msrb.mxu0 %v3228_v11 }
  0xb3   :  { %1983 = vmatpush.bf16.msrb.mxu2 %v3244_v12 }
  0xb4   :  { %1970 = vmatpush.bf16.msrb.mxu1 %v3236_v14 }
  0xb5   :  { %1996 = vmatpush.bf16.msrb.mxu3 %v3252_v15 }
  0xb6   :  { %1958 = vmatpush.bf16.msrb.mxu0 %v3227_v17 }
  0xb7   :  { %1984 = vmatpush.bf16.msrb.mxu2 %v3243_v18 }
  0xb8   :  { %1971 = vmatpush.bf16.msrb.mxu1 %v3235_v22 }
  0xb9   :  { %1997 = vmatpush.bf16.msrb.mxu3 %v3251_v23  ;;  %v3272_v23 = vld [vmem:[%s4039_s3 + $0x38] sm:$0xff] }
  0xba   :  { %1959 = vmatpush.bf16.msrb.mxu0 %v3226_v24 }
  0xbb   :  { %1985 = vmatpush.bf16.msrb.mxu2 %v3242_v26  ;;  %v3271_v26 = vld [vmem:[%s4039_s3 + $0x30] sm:$0xff] }
  0xbc   :  { %1972 = vmatpush.bf16.msrb.mxu1 %v3234_v33 }
  0xbd   :  { %1998 = vmatpush.bf16.msrb.mxu3 %v3250_v34  ;;  %v3268_v34 = vld [vmem:[%s4039_s3 + $0x18] sm:$0xff] }
  0xbe   :  { %1960 = vmatpush.bf16.msrb.mxu0 %v3225_v36  ;;  %v1754_v45 = vpop.f32.mrf.mxu0  ;;  %v3266_v36 = vld [vmem:[%s4039_s3 + $0x8] sm:$0xff] }
  0xbf   :  { %1986 = vmatpush.bf16.msrb.mxu2 %v3241_v37  ;;  %v1755_v46 = vadd.f32 %v1754_v45, %v1742_v25  ;;  %v3279_v45 = vld [vmem:[%s4041_s5 + $0x30] sm:$0xff] }
  0xc0   :  { %1973 = vmatpush.bf16.msrb.mxu1 %v3233_v40  ;;  %v1767_v47 = vpop.f32.mrf.mxu1 }
  0xc1   :  { %1999 = vmatpush.bf16.msrb.mxu3 %v3249_v41  ;;  %1961 = vmatmul.bf16.vlgmr.msrb.gmra.mxu0 %v461_v27  ;;  %v1768_v48 = vadd.f32 %v1767_v47, %v1755_v46  ;;  %v3280_v41 = vld [vmem:[%s4041_s5 + $0x38] sm:$0xff] }
  0xc2   :  { %2005 = vmatpush.bf16.msra.mxu0 %v3264_v38  ;;  %1987 = vmatmul.bf16.vlgmr.msrb.gmra.mxu2 %v463_v28  ;;  %v3265_v38 = vld [vmem:[%s4039_s3] sm:$0xff] }
  0xc3   :  { %1974 = vmatmul.bf16.vlgmr.msrb.gmra.mxu1 %v462_v30  ;;  %2171 = vmatpush.bf16.msra.mxu2 %v3280_v41 }
  0xc4   :  { %2000 = vmatmul.bf16.vlgmr.msrb.gmra.mxu3 %v464_v31  ;;  %2088 = vmatpush.bf16.msra.mxu1 %v3272_v23  ;;  %v3269_v31 = vld [vmem:[%s4039_s3 + $0x20] sm:$0xff] }
  0xc5   :  { %v1780_v50 = vpop.f32.mrf.mxu2 }
  0xc6   :  { %2006 = vmatpush.bf16.msra.mxu0 %v3263_v42  ;;  %v1781_v51 = vadd.f32 %v1780_v50, %v1768_v48  ;;  %v1756_v54 = vpop.f32.mrf.mxu0  ;;  %v3278_v48 = vld [vmem:[%s4041_s5 + $0x28] sm:$0xff] }
  0xc7   :  { %v1793_v53 = vpop.f32.mrf.mxu3  ;;  %2172 = vmatpush.bf16.msra.mxu2 %v3279_v45 }
  0xc8   :  { %v1794_v55 = vadd.f32 %v1793_v53, %v1781_v51  ;;  %v1769_v56 = vpop.f32.mrf.mxu1  ;;  %2089 = vmatpush.bf16.msra.mxu1 %v3271_v26 }
  0xca   :  { %2007 = vmatpush.bf16.msra.mxu0 %v3262_v43 }
  0xcb   :  { %2173 = vmatpush.bf16.msra.mxu2 %v3278_v48 }
  0xcc   :  { %2090 = vmatpush.bf16.msra.mxu1 %v3270_v29 }
  0xcd   :  { %v1782_v58 = vpop.f32.mrf.mxu2 }
  0xce   :  { %2008 = vmatpush.bf16.msra.mxu0 %v3261_v44 }
  0xcf   :  { %v1795_v60 = vpop.f32.mrf.mxu3 }
  0xd0   :  { %2091 = vmatpush.bf16.msra.mxu1 %v3269_v31 }
  0xd2   :  { %2009 = vmatpush.bf16.msra.mxu0 %v3260_v49 }
  0xd4   :  { %2092 = vmatpush.bf16.msra.mxu1 %v3268_v34 }
  0xd6   :  { %2010 = vmatpush.bf16.msra.mxu0 %v3259_v52  ;;  %v3277_v52 = vld [vmem:[%s4041_s5 + $0x20] sm:$0xff] }
  0xd7   :  { %2174 = vmatpush.bf16.msra.mxu2 %v3277_v52 }
  0xd8   :  { %2093 = vmatpush.bf16.msra.mxu1 %v3267_v35 }
  0xda   :  { %2011 = vmatpush.bf16.msra.mxu0 %v3258_v57  ;;  %v3275_v57 = vld [vmem:[%s4041_s5 + $0x10] sm:$0xff] }
  0xdc   :  { %2094 = vmatpush.bf16.msra.mxu1 %v3266_v36 }
  0xde   :  { %2012 = vmatpush.bf16.msra.mxu0 %v3257_v59  ;;  %v1806_v62 = vpop.f32.mrf.mxu0 }
  0xdf   :  { %v1807_v63 = vadd.f32 %v1806_v62, %v1794_v55  ;;  %v3276_v55 = vld [vmem:[%s4041_s5 + $0x18] sm:$0xff] }
  0xe0   :  { %v1819_v0 = vpop.f32.mrf.mxu1  ;;  %2095 = vmatpush.bf16.msra.mxu1 %v3265_v38  ;;  %2175 = vmatpush.bf16.msra.mxu2 %v3276_v55 }
  0xe1   :  { %2013 = vmatmul.bf16.vlgmr.msra.gmra.mxu0 %v467_v61  ;;  %v1820_v1 = vadd.f32 %v1819_v0, %v1807_v63 }
  0xe4   :  { %2176 = vmatpush.bf16.msra.mxu2 %v3275_v57 }
  0xe5   :  { %v1832_v2 = vpop.f32.mrf.mxu2 }
  0xe6   :  { %v1833_v3 = vadd.f32 %v1832_v2, %v1820_v1  ;;  %v1808_v5 = vpop.f32.mrf.mxu0  ;;  %v3274_v1 = vld [vmem:[%s4041_s5 + $0x8] sm:$0xff]  ;;  %v3273_v2 = vld [vmem:[%s4041_s5] sm:$0xff]  ;;  %s2192_s5 = sshll.u32 %s4043_s7, 4  ;;  %s2193_s5 = int_to_ptr.hbm [resolvable:$true] %s2192_s5 }
  0xe7   :  { %v1845_v4 = vpop.f32.mrf.mxu3 }
  0xe8   :  { %v1846_v6 = vadd.f32 %v1845_v4, %v1833_v3  ;;  %v1821_v7 = vpop.f32.mrf.mxu1  ;;  %2177 = vmatpush.bf16.msra.mxu2 %v3274_v1  ;;  %v3283_v3 = vld [vmem:[%s4040_s4] ss:$0 sm:$0xff] }
  0xec   :  { %2178 = vmatpush.bf16.msra.mxu2 %v3273_v2 }
  0xed   :  { %v1834_v8 = vpop.f32.mrf.mxu2 }
  0xef   :  { %v1847_v9 = vpop.f32.mrf.mxu3 }
  0xf0   :  { %v3284_v9 = vld [vmem:[%s4042_s6] ss:$0 sm:$0xff] }
  0xfe   :  { %v1858_v10 = vpop.f32.mrf.mxu0 }
  0xff   :  { %v1859_v11 = vadd.f32 %v1858_v10, %v1846_v6 }
 0x100   :  { %v1871_v12 = vpop.f32.mrf.mxu1 }
 0x101   :  { %v1872_v13 = vadd.f32 %v1871_v12, %v1859_v11 }
 0x105   :  { %v1884_v14 = vpop.f32.mrf.mxu2 }
 0x106   :  { %v1885_v15 = vadd.f32 %v1884_v14, %v1872_v13  ;;  %v1860_v17 = vpop.f32.mrf.mxu0 }
 0x107   :  { %v1897_v16 = vpop.f32.mrf.mxu3 }
 0x108   :  { %v1898_v18 = vadd.f32 %v1897_v16, %v1885_v15  ;;  %v1873_v19 = vpop.f32.mrf.mxu1 }
 0x10d   :  { %v1886_v20 = vpop.f32.mrf.mxu2 }
 0x10f   :  { %v1899_v21 = vpop.f32.mrf.mxu3 }
 0x11e   :  { %v1910_v22 = vpop.f32.mrf.mxu0 }
 0x11f   :  { %v1911_v42 = vadd.f32 %v1910_v22, %v1898_v18 }
 0x120   :  { %v1923_v24 = vpop.f32.mrf.mxu1 }
 0x121   :  { %v1924_v47 = vadd.f32 %v1923_v24, %v1911_v42 }
 0x125   :  { %v1936_v25 = vpop.f32.mrf.mxu2 }
 0x126   :  { %v1912_v28 = vpop.f32.mrf.mxu0  ;;  %v1937_v49 = vadd.f32 %v1936_v25, %v1924_v47 }
 0x127   :  { %v1949_v27 = vpop.f32.mrf.mxu3 }
 0x128   :  { %v1925_v30 = vpop.f32.mrf.mxu1  ;;  %v1950_v53 = vadd.f32 %v1949_v27, %v1937_v49 }
 0x12d   :  { %v1938_v32 = vpop.f32.mrf.mxu2 }
 0x12f   :  { %v1951_v33 = vpop.f32.mrf.mxu3 }
 0x13e   :  { %v1962_v37 = vpop.f32.mrf.mxu0 }
 0x13f   :  { %v1963_v54 = vadd.f32 %v1962_v37, %v1950_v53 }
 0x140   :  { %v1975_v39 = vpop.f32.mrf.mxu1 }
 0x141   :  { %v1976_v56 = vadd.f32 %v1975_v39, %v1963_v54 }
 0x145   :  { %v1988_v40 = vpop.f32.mrf.mxu2 }
 0x146   :  { %v1964_v44 = vpop.f32.mrf.mxu0  ;;  %v1989_v58 = vadd.f32 %v1988_v40, %v1976_v56 }
 0x147   :  { %v2001_v43 = vpop.f32.mrf.mxu3 }
 0x148   :  { %v1977_v46 = vpop.f32.mrf.mxu1  ;;  %v2002_v59 = vadd.f32 %v2001_v43, %v1989_v58 }
 0x14d   :  { %v1990_v50 = vpop.f32.mrf.mxu2 }
 0x14f   :  { %v2003_v51 = vpop.f32.mrf.mxu3 }
 0x15e   :  { %v2014_v60 = vpop.f32.mrf.mxu0 }
 0x15f   :  { %v2015_v61 = vadd.f32 %v2014_v60, %v2002_v59 }
 0x161   :  { %v2018_v62 = vmax.f32 %v2015_v61, 0.0 }
 0x163   :  { %v2019_v63 = vpack.c.bf16 %v2018_v62, %v2018_v62 }
 0x165   :  { %2096 = vmatmul.bf16.vlgmr.msra.gmra.mxu1 %v2019_v63 }
 0x166   :  { %v2016_v0 = vpop.f32.mrf.mxu0 }
 0x1e2   :  { %v2097_v4 = vpop.f32.mrf.mxu1 }
 0x1e3   :  { %v2098_v5 = vadd.f32 %v3283_v3, %v2097_v4 }
 0x1e5   :  { %v2101_v6 = vmax.f32 %v2098_v5, 0.0 }
 0x1e7   :  { %v2102_v7 = vpack.c.bf16 %v2101_v6, %v2101_v6 }
 0x1e9   :  { %2179 = vmatmul.bf16.vlgmr.msra.gmra.mxu2 %v2102_v7 }
 0x1ea   :  { %v2099_v8 = vpop.f32.mrf.mxu1 }
 0x26c   :  { %v2180_v10 = vpop.f32.mrf.mxu2 }
 0x26d   :  { %v2181_v11 = vadd.f32 %v3284_v9, %v2180_v10 }
 0x26f   :  { %2184 = vst [vmem:[#allocation2] sm:$0x3] %v2181_v11 }
 0x270   :  { %2195 = dma.vmem_to_hbm [thread:$0]  %s2191_s24, 32, %s2193_s5, [#allocation3]  }
 0x274   :  { %v2182_v12 = vpop.f32.mrf.mxu2 }
 0x275   :  { %3309 = dma.done.wait [#allocation3], 32  }
 0x276   :  { %3310 = vsyncadd [#allocation3], 4294967264 }
 0x277   :  { %2200 = vsyncpa [#allocation3], 1 }

</bundles_post_ra>
